<compile_context>
chip_gen: v7x
topology: tpu7x:2x2x1
jax: 0.10.0
libtpu: 0.0.40
codegen_flags: <defaults>
</compile_context>

<pallas_src>
import jax
import jax.numpy as jnp
from jax.experimental import pallas as pl
from jax.experimental.pallas import tpu as pltpu

_D_IN, _D_H1, _D_H2, _D_OUT = 128, 256, 512, 784
_D_OUT_PAD = 896  # 7 * 128 lanes (lane-dense output)


def _leaky_relu(x, slope=0.2):
    return jnp.where(x > 0, x, slope * x)


def _round_up(n, m):
    return ((n + m - 1) // m) * m


def gennet_kernel(x_ref, w1_ref, w2_ref, w3_ref, o_ref):
    # x_ref: (TB, 128)  w1: (128, 256) bf16  w2: (256, 512) bf16
    # w3: (512, 896) bf16 (zero-padded)  o_ref: (TB, 896) f32
    x = x_ref[...].astype(jnp.bfloat16)  # cast on the VPU, hidden under MXU work

    h1 = jnp.dot(x, w1_ref[...], preferred_element_type=jnp.float32)
    h1 = _leaky_relu(h1, 0.2)

    h2 = jnp.dot(h1.astype(jnp.bfloat16), w2_ref[...],
                 preferred_element_type=jnp.float32)
    h2 = _leaky_relu(h2, 0.2)

    h3 = jnp.dot(h2.astype(jnp.bfloat16), w3_ref[...],
                 preferred_element_type=jnp.float32)
    o_ref[...] = jnp.tanh(h3).astype(o_ref.dtype)


def _vmem_capacity_bytes():
    try:
        return int(pltpu.get_tpu_info().vmem_capacity_bytes)
    except Exception:
        return 64 * 1024 * 1024  # conservative (v7x per-TC)


def _pick_batch_tile(vmem_bytes):
    # ~13 KB of VMEM per batch row (double-buffered bf16 input tile, f32
    # output tile, f32/bf16 intermediates).  Keep well under the scoped VMEM.
    per_row = 13 * 1024
    budget = vmem_bytes // 4
    cap = 512 if vmem_bytes <= 64 * 1024 * 1024 else 1024  # smaller tile on v7x
    tb = (budget // per_row) // 256 * 256
    return max(256, min(cap, tb))


def gennet_forward(x, w1, w2, w3):
    """x: any shape whose element count is divisible by 128 (x.view(-1, 128)).
    Weights are (in_features, out_features); fc3 may be (512, 784) or already
    padded to (512, 896)."""
    x2d = x.reshape(-1, _D_IN)
    B = x2d.shape[0]

    vmem_bytes = _vmem_capacity_bytes()
    tb_target = _pick_batch_tile(vmem_bytes)
    TB = min(tb_target, _round_up(B, 8))        # multiple of 8 sublanes
    Bp = _round_up(B, TB)
    if Bp != B:
        x2d = jnp.pad(x2d, ((0, Bp - B), (0, 0)))

    # bf16 weights, last layer zero-padded to 896 lanes.
    w1b = w1.astype(jnp.bfloat16)
    w2b = w2.astype(jnp.bfloat16)
    w3b = w3.astype(jnp.bfloat16)
    if w3b.shape[1] != _D_OUT_PAD:
        w3b = jnp.pad(w3b, ((0, 0), (0, _D_OUT_PAD - w3b.shape[1])))

    grid = (pl.cdiv(Bp, TB),)
    out = pl.pallas_call(
        gennet_kernel,
        out_shape=jax.ShapeDtypeStruct((Bp, _D_OUT_PAD), jnp.float32),
        grid_spec=pltpu.PrefetchScalarGridSpec(
            num_scalar_prefetch=0,
            grid=grid,
            in_specs=[
                pl.BlockSpec((TB, _D_IN), lambda i: (i, 0)),
                pl.BlockSpec((_D_IN, _D_H1), lambda i: (0, 0)),
                pl.BlockSpec((_D_H1, _D_H2), lambda i: (0, 0)),
                pl.BlockSpec((_D_H2, _D_OUT_PAD), lambda i: (0, 0)),
            ],
            out_specs=pl.BlockSpec((TB, _D_OUT_PAD), lambda i: (i, 0)),
        ),
        compiler_params=pltpu.CompilerParams(
            dimension_semantics=("parallel",),
            vmem_limit_bytes=min(vmem_bytes // 2, 128 * 1024 * 1024),
        ),
    )(x2d, w1b, w2b, w3b)
    return out[:B, :_D_OUT]


def init_params(key):
    """Deterministic synthetic weights.  PyTorch Linear stores (out, in); we
    store the transpose (in, out) in bf16 so the kernel computes x @ W."""
    k1, k2, k3 = jax.random.split(key, 3)

    def linear_t(k, fan_in, fan_out):
        bound = 1.0 / jnp.sqrt(fan_in)  # nn.Linear default init bound
        w = jax.random.uniform(k, (fan_in, fan_out), jnp.float32,
                               minval=-bound, maxval=bound)
        return w.astype(jnp.bfloat16)

    w1 = linear_t(k1, _D_IN, _D_H1)
    w2 = linear_t(k2, _D_H1, _D_H2)
    w3 = linear_t(k3, _D_H2, _D_OUT)
    return w1, w2, w3


def gennet_reference(x, w1, w2, w3):
    """Plain-JAX f32 reference (same bf16-stored weights, f32 math)."""
    x2d = x.reshape(-1, _D_IN).astype(jnp.float32)
    h1 = _leaky_relu(x2d @ w1.astype(jnp.float32), 0.2)
    h2 = _leaky_relu(h1 @ w2.astype(jnp.float32), 0.2)
    return jnp.tanh(h2 @ w3.astype(jnp.float32))


if __name__ == "__main__":
    key = jax.random.PRNGKey(0)
    kx, kp = jax.random.split(key)

    # small batch of latent vectors, z-dim = 128 (as implied by fc1)
    x = jax.random.normal(kx, (8, _D_IN), dtype=jnp.float32)
    w1, w2, w3 = init_params(kp)

    out = gennet_forward(x, w1, w2, w3)
    out = jax.block_until_ready(out)

    ref = gennet_reference(x, w1, w2, w3)
    assert out.shape == (8, _D_OUT), out.shape
    # bf16 MXU matmuls vs f32 reference: tanh outputs are in [-1, 1], so a
    # 2e-2 absolute tolerance comfortably covers bf16 rounding.
    max_err = float(jnp.max(jnp.abs(out - ref)))
    assert max_err < 2e-2, f"mismatch vs reference, max abs err = {max_err}"

    print("KERNEL_OK")
</pallas_src>

<mosaic_0001>
module attributes {stable_mosaic.version = 11 : i64} {
  func.func @gennet_kernel(%arg0: i32, %arg1: memref<8x128xf32, #tpu.memory_space<vmem>>, %arg2: memref<128x256xbf16, #tpu.memory_space<vmem>>, %arg3: memref<256x512xbf16, #tpu.memory_space<vmem>>, %arg4: memref<512x896xbf16, #tpu.memory_space<vmem>>, %arg5: memref<8x896xf32, #tpu.memory_space<vmem>>) attributes {dimension_semantics = [#tpu.dimension_semantics<parallel>], iteration_bounds = array<i64: 1>, scalar_prefetch = 0 : i64, scratch_operands = 0 : i64, tpu.core_type = #tpu.core_type<tc>, window_params = [{transform_indices = @transform_0, window_bounds = array<i64: 8, 128>}, {pipeline_mode = #tpu.pipeline_mode<synchronous>, transform_indices = @transform_1, window_bounds = array<i64: 128, 256>}, {pipeline_mode = #tpu.pipeline_mode<synchronous>, transform_indices = @transform_2, window_bounds = array<i64: 256, 512>}, {pipeline_mode = #tpu.pipeline_mode<synchronous>, transform_indices = @transform_3, window_bounds = array<i64: 512, 896>}, {transform_indices = @transform_4, window_bounds = array<i64: 8, 896>}]} {
    %c0 = arith.constant 0 : index
    %c0_0 = arith.constant 0 : index
    %0 = vector.load %arg1[%c0, %c0_0] : memref<8x128xf32, #tpu.memory_space<vmem>>, vector<8x128xf32>
    %1 = arith.truncf %0 : vector<8x128xf32> to vector<8x128xbf16>
    %c0_1 = arith.constant 0 : index
    %c0_2 = arith.constant 0 : index
    %2 = vector.load %arg2[%c0_1, %c0_2] : memref<128x256xbf16, #tpu.memory_space<vmem>>, vector<128x256xbf16>
    %cst = arith.constant dense<0.000000e+00> : vector<8x256xf32>
    %3 = tpu.matmul %1, %2, %cst {dimension_numbers = #tpu.dot_dimension_numbers<[1], [0], [0], [1], [0, 0, 1, 1], [], []>} : vector<8x128xbf16>, vector<128x256xbf16>, vector<8x256xf32> -> vector<8x256xf32>
    %cst_3 = arith.constant 0.000000e+00 : f32
    %4 = vector.broadcast %cst_3 : f32 to vector<8x256xf32>
    %5 = arith.cmpf ogt, %3, %4 : vector<8x256xf32>
    %cst_4 = arith.constant 2.000000e-01 : f32
    %6 = vector.broadcast %cst_4 : f32 to vector<8x256xf32>
    %7 = arith.mulf %6, %3 : vector<8x256xf32>
    %8 = arith.select %5, %3, %7 : vector<8x256xi1>, vector<8x256xf32>
    %9 = arith.truncf %8 : vector<8x256xf32> to vector<8x256xbf16>
    %c0_5 = arith.constant 0 : index
    %c0_6 = arith.constant 0 : index
    %10 = vector.load %arg3[%c0_5, %c0_6] : memref<256x512xbf16, #tpu.memory_space<vmem>>, vector<256x512xbf16>
    %cst_7 = arith.constant dense<0.000000e+00> : vector<8x512xf32>
    %11 = tpu.matmul %9, %10, %cst_7 {dimension_numbers = #tpu.dot_dimension_numbers<[1], [0], [0], [1], [0, 0, 1, 1], [], []>} : vector<8x256xbf16>, vector<256x512xbf16>, vector<8x512xf32> -> vector<8x512xf32>
    %cst_8 = arith.constant 0.000000e+00 : f32
    %12 = vector.broadcast %cst_8 : f32 to vector<8x512xf32>
    %13 = arith.cmpf ogt, %11, %12 : vector<8x512xf32>
    %cst_9 = arith.constant 2.000000e-01 : f32
    %14 = vector.broadcast %cst_9 : f32 to vector<8x512xf32>
    %15 = arith.mulf %14, %11 : vector<8x512xf32>
    %16 = arith.select %13, %11, %15 : vector<8x512xi1>, vector<8x512xf32>
    %17 = arith.truncf %16 : vector<8x512xf32> to vector<8x512xbf16>
    %c0_10 = arith.constant 0 : index
    %c0_11 = arith.constant 0 : index
    %18 = vector.load %arg4[%c0_10, %c0_11] : memref<512x896xbf16, #tpu.memory_space<vmem>>, vector<512x896xbf16>
    %cst_12 = arith.constant dense<0.000000e+00> : vector<8x896xf32>
    %19 = tpu.matmul %17, %18, %cst_12 {dimension_numbers = #tpu.dot_dimension_numbers<[1], [0], [0], [1], [0, 0, 1, 1], [], []>} : vector<8x512xbf16>, vector<512x896xbf16>, vector<8x896xf32> -> vector<8x896xf32>
    %20 = math.tanh %19 : vector<8x896xf32>
    %c0_13 = arith.constant 0 : index
    %c0_14 = arith.constant 0 : index
    %21 = vector.load %arg5[%c0_13, %c0_14] : memref<8x896xf32, #tpu.memory_space<vmem>>, vector<8x896xf32>
    tpu.vector_store %arg5[%c0_13, %c0_14], %20 {strides = array<i32>} : memref<8x896xf32, #tpu.memory_space<vmem>>, vector<8x896xf32>,
    return
  }
  func.func @transform_0(%arg0: i32) -> (i32, i32) {
    %c0_i32 = arith.constant 0 : i32
    %c0_i32_0 = arith.constant 0 : i32
    return %arg0, %c0_i32 : i32, i32
  }
  func.func @transform_1(%arg0: i32) -> (i32, i32) {
    %c0_i32 = arith.constant 0 : i32
    %c0_i32_0 = arith.constant 0 : i32
    %c0_i32_1 = arith.constant 0 : i32
    return %c0_i32, %c0_i32_0 : i32, i32
  }
  func.func @transform_2(%arg0: i32) -> (i32, i32) {
    %c0_i32 = arith.constant 0 : i32
    %c0_i32_0 = arith.constant 0 : i32
    %c0_i32_1 = arith.constant 0 : i32
    return %c0_i32, %c0_i32_0 : i32, i32
  }
  func.func @transform_3(%arg0: i32) -> (i32, i32) {
    %c0_i32 = arith.constant 0 : i32
    %c0_i32_0 = arith.constant 0 : i32
    %c0_i32_1 = arith.constant 0 : i32
    return %c0_i32, %c0_i32_0 : i32, i32
  }
  func.func @transform_4(%arg0: i32) -> (i32, i32) {
    %c0_i32 = arith.constant 0 : i32
    %c0_i32_0 = arith.constant 0 : i32
    return %arg0, %c0_i32 : i32, i32
  }
}

</mosaic_0001>

<bundles_post_ra>
// kernel: tpu_custom_call.1
= control target key start
LH: loop header
LB: loop body
LE: loop exit
PB: predicated region body
PF: predicated region fallthrough
CT: control target
= control target key end

     0   :  { %9 = vsyncpa [#allocation3], 0  ;;  %s3536_s0 = inlined_call_operand.hbm [shape: f32[8,128], index: 0, kind: input, shape index: {}]   ;;  %s3537_s1 = inlined_call_operand.hbm [shape: bf16[128,256], index: 1, kind: input, shape index: {}]   ;;  %s3538_s2 = inlined_call_operand.hbm [shape: bf16[256,512], index: 2, kind: input, shape index: {}]   ;;  %s3539_s3 = inlined_call_operand.hbm [shape: bf16[512,896], index: 3, kind: input, shape index: {}]   ;;  %s3540_s4 = inlined_call_operand.hbm [shape: f32[8,896], index: 4, kind: output, shape index: {}]  }
   0x1   :  { %10 = vsyncpa [#allocation6], 0 }
   0x2   :  { %11 = vsyncpa [#allocation9], 0 }
   0x3   :  { %12 = vsyncpa [#allocation4], 0  ;;  %s3410_s15 = smov [#allocation5]   ;;  %s3292_s19 = scalar_lea.hbm %s3537_s1, 2048 }
   0x4   :  { %s28_s16 = sshll.u32 %s3410_s15, 4  ;;  %p3293_p0 = scmp.ne.s32.totalorder %s3537_s1, %s3292_s19  ;;  %s29_s16 = int_to_ptr.vmem [resolvable:$true] %s28_s16 }
   0x5   :  { %p3296_p1 = scmp.lt.u32.totalorder %s3292_s19, %s3537_s1 }
   0x7   :  { %p3298_p2 = pnand %p3296_p1, %p3293_p0 }
   0x9   :  { %3301 = shalt.err (!%p3298_p2)
}
   0xa   :  { %s3302_s24 = scalar_lea.vmem %s29_s16, 2048  ;;  %p3307_p4 = scmp.lt.s32.totalorder %s29_s16, %s29_s16 }
   0xb   :  { %p3303_p3 = scmp.ne.s32.totalorder %s29_s16, %s3302_s24  ;;  %p3308_p5 = scmp.lt.s32.totalorder %s3302_s24, %s3302_s24 }
   0xd   :  { %p3309_p6 = por %p3308_p5, %p3307_p4 }
   0xf   :  { %p3310_p7 = pnand %p3309_p6, %p3303_p3 }
  0x11   :  { %3313 = shalt.err (!%p3310_p7)
}
  0x12   :  { %s3411_s25 = smov 128   ;;  %s3412_s26 = smov 8  }
  0x13   :  { %34 = dma.hbm_to_vmem [thread:$0]  %s3537_s1, 2048, %s29_s16, [#allocation6], %s3411_s25, %s3411_s25, %s3412_s26  }
  0x14   :  { %s3413_s29 = smov [#allocation2]   ;;  %s3414_s5 = smov [#allocation7]  }
  0x15   :  { %s19_s30 = sshll.u32 %s3413_s29, 4  ;;  %s40_s6 = sshll.u32 %s3414_s5, 4  ;;  %s20_s30 = int_to_ptr.vmem [resolvable:$true] %s19_s30  ;;  %s41_s6 = int_to_ptr.vmem [resolvable:$true] %s40_s6 }
  0x16   :  { %s3314_s9 = scalar_lea.hbm %s3536_s0, 128 }
  0x17   :  { %p3315_p8 = scmp.ne.s32.totalorder %s3536_s0, %s3314_s9  ;;  %p3318_p9 = scmp.lt.u32.totalorder %s3314_s9, %s3536_s0 }
  0x19   :  { %p3320_p10 = pnand %p3318_p9, %p3315_p8 }
  0x1b   :  { %3323 = shalt.err (!%p3320_p10)
}
  0x1c   :  { %s3324_s1 = scalar_lea.vmem %s20_s30, 128  ;;  %p3329_p12 = scmp.lt.s32.totalorder %s20_s30, %s20_s30 }
  0x1d   :  { %p3325_p11 = scmp.ne.s32.totalorder %s20_s30, %s3324_s1  ;;  %p3330_p13 = scmp.lt.s32.totalorder %s3324_s1, %s3324_s1 }
  0x1f   :  { %p3331_p0 = por %p3330_p13, %p3329_p12 }
  0x21   :  { %p3332_p1 = pnand %p3331_p0, %p3325_p11 }
  0x23   :  { %3335 = shalt.err (!%p3332_p1)
}
  0x24   :  { %22 = dma.hbm_to_vmem [thread:$0]  %s3536_s0, 128, %s20_s30, [#allocation3]  }
  0x25   :  { %s3336_s18 = scalar_lea.hbm %s3538_s2, 8192 }
  0x26   :  { %p3337_p2 = scmp.ne.s32.totalorder %s3538_s2, %s3336_s18  ;;  %p3340_p3 = scmp.lt.u32.totalorder %s3336_s18, %s3538_s2 }
  0x28   :  { %p3342_p4 = pnand %p3340_p3, %p3337_p2 }
  0x2a   :  { %3345 = shalt.err (!%p3342_p4)
}
  0x2b   :  { %s3346_s23 = scalar_lea.vmem %s41_s6, 8192  ;;  %p3351_p6 = scmp.lt.s32.totalorder %s41_s6, %s41_s6 }
  0x2c   :  { %p3347_p5 = scmp.ne.s32.totalorder %s41_s6, %s3346_s23  ;;  %p3352_p7 = scmp.lt.s32.totalorder %s3346_s23, %s3346_s23 }
  0x2e   :  { %p3353_p8 = por %p3352_p7, %p3351_p6 }
  0x30   :  { %p3354_p9 = pnand %p3353_p8, %p3347_p5 }
  0x32   :  { %3357 = shalt.err (!%p3354_p9)
}
  0x33   :  { %s3415_s0 = smov 256   ;;  %s3416_s24 = smov 16  }
  0x34   :  { %46 = dma.hbm_to_vmem [thread:$0]  %s3538_s2, 8192, %s41_s6, [#allocation6], %s3415_s0, %s3415_s0, %s3416_s24  }
  0x35   :  { %s3417_s27 = smov [#allocation8]   ;;  %s3358_s5 = scalar_lea.hbm %s3539_s3, 28672 }
  0x36   :  { %s52_s28 = sshll.u32 %s3417_s27, 4  ;;  %p3359_p10 = scmp.ne.s32.totalorder %s3539_s3, %s3358_s5  ;;  %s53_s28 = int_to_ptr.vmem [resolvable:$true] %s52_s28 }
  0x37   :  { %p3362_p11 = scmp.lt.u32.totalorder %s3358_s5, %s3539_s3 }
  0x39   :  { %p3364_p12 = pnand %p3362_p11, %p3359_p10 }
  0x3b   :  { %3367 = shalt.err (!%p3364_p12)
}
  0x3c   :  { %s3368_s11 = scalar_lea.vmem %s53_s28, 28672  ;;  %p3373_p0 = scmp.lt.s32.totalorder %s53_s28, %s53_s28 }
  0x3d   :  { %p3369_p13 = scmp.ne.s32.totalorder %s53_s28, %s3368_s11  ;;  %p3374_p1 = scmp.lt.s32.totalorder %s3368_s11, %s3368_s11 }
  0x3f   :  { %p3375_p2 = por %p3374_p1, %p3373_p0 }
  0x41   :  { %p3376_p3 = pnand %p3375_p2, %p3369_p13 }
  0x43   :  { %3379 = shalt.err (!%p3376_p3)
}
  0x44   :  { %s3418_s2 = smov 448   ;;  %s3419_s6 = smov 28  }
  0x45   :  { %58 = dma.hbm_to_vmem [thread:$0]  %s3539_s3, 28672, %s53_s28, [#allocation9], %s3418_s2, %s3418_s2, %s3419_s6  }
  0x46   :  { %3402 = dma.done.wait [#allocation3], 128  }
  0x47   :  { %3403 = vsyncadd [#allocation3], 4294967168 }
  0x48   :  { %3404 = dma.done.wait [#allocation6], 10240  }
  0x49   :  { %3405 = vsyncadd [#allocation6], 4294957056 }
  0x4a   :  { %3406 = dma.done.wait [#allocation9], 28672  }
  0x4b   :  { %3407 = vsyncadd [#allocation9], 4294938624  ;;  %v3420_v0 = vmov 0   ;;  %v2838_v1 = vld [vmem:[#allocation5 + $0x4] ss:$8 sps:$4 sm:$0xff]   ;;  %v72_v26 = vld [vmem:[#allocation2] sm:$0xff] }
  0x4c   :  { %202 = vmatprep.mubr.bf16.mxu0 %v3420_v0  ;;  %v2840_v2 = vld [vmem:[#allocation5] ss:$8 sps:$4 sm:$0xff]   ;;  %170 = vmatprep.subr.bf16.mxu0 %v2838_v1  ;;  %v2841_v3 = vld [vmem:[#allocation5 + $0x14] ss:$8 sps:$4 sm:$0xff]   ;;  %v2843_v4 = vld [vmem:[#allocation5 + $0x10] ss:$8 sps:$4 sm:$0xff]   ;;  %v73_v30 = vpack.c.bf16 %v72_v26, %v72_v26 }
  0x4d   :  { %171 = vmatpush1.bf16.msra.mxu0 %v2840_v2  ;;  %v2844_v5 = vld [vmem:[#allocation5 + $0x24] ss:$8 sps:$4 sm:$0xff]   ;;  %v2846_v6 = vld [vmem:[#allocation5 + $0x20] ss:$8 sps:$4 sm:$0xff]   ;;  %v2847_v7 = vld [vmem:[#allocation5 + $0x34] ss:$8 sps:$4 sm:$0xff]  }
  0x4e   :  { %172 = vmatprep.subr.bf16.mxu0 %v2841_v3  ;;  %v2849_v8 = vld [vmem:[#allocation5 + $0x30] ss:$8 sps:$4 sm:$0xff]   ;;  %v2862_v9 = vld [vmem:[#allocation7 + $0x4] ss:$16 sps:$4 sm:$0xff]   ;;  %v2852_v13 = vld [vmem:[#allocation5 + $0x40] ss:$8 sps:$4 sm:$0xff]  }
  0x4f   :  { %v2850_v10 = vld [vmem:[#allocation5 + $0x44] ss:$8 sps:$4 sm:$0xff]   ;;  %603 = vmatprep.subr.bf16.mxu1 %v2862_v9  ;;  %v2867_v11 = vld [vmem:[#allocation7] ss:$16 sps:$4 sm:$0xff]   ;;  %v2853_v14 = vld [vmem:[#allocation5 + $0x54] ss:$8 sps:$4 sm:$0xff]  }
  0x50   :  { %v2868_v12 = vld [vmem:[#allocation7 + $0x24] ss:$16 sps:$4 sm:$0xff]   ;;  %604 = vmatpush1.bf16.msra.mxu1 %v2867_v11  ;;  %v2873_v15 = vld [vmem:[#allocation7 + $0x20] ss:$16 sps:$4 sm:$0xff]   ;;  %v2866_v27 = vld [vmem:[#allocation7 + $0xc] ss:$16 sps:$4 sm:$0xff]  }
  0x51   :  { %173 = vmatpush1.bf16.msra.mxu0 %v2843_v4  ;;  %605 = vmatprep.subr.bf16.mxu1 %v2868_v12  ;;  %v2874_v16 = vld [vmem:[#allocation7 + $0x44] ss:$16 sps:$4 sm:$0xff]   ;;  %v2855_v17 = vld [vmem:[#allocation5 + $0x50] ss:$8 sps:$4 sm:$0xff]   ;;  %v2858_v21 = vld [vmem:[#allocation5 + $0x60] ss:$8 sps:$4 sm:$0xff]  }
  0x52   :  { %174 = vmatprep.subr.bf16.mxu0 %v2844_v5  ;;  %v2856_v18 = vld [vmem:[#allocation5 + $0x64] ss:$8 sps:$4 sm:$0xff]   ;;  %v2879_v19 = vld [vmem:[#allocation7 + $0x40] ss:$16 sps:$4 sm:$0xff]   ;;  %v2859_v22 = vld [vmem:[#allocation5 + $0x74] ss:$8 sps:$4 sm:$0xff]  }
  0x53   :  { %v2880_v20 = vld [vmem:[#allocation7 + $0x64] ss:$16 sps:$4 sm:$0xff]   ;;  %v2885_v23 = vld [vmem:[#allocation7 + $0x60] ss:$16 sps:$4 sm:$0xff]   ;;  %v2864_v31 = vld [vmem:[#allocation7 + $0x8] ss:$16 sps:$4 sm:$0xff]  }
  0x54   :  { %606 = vmatpush1.bf16.msra.mxu1 %v2873_v15  ;;  %v2886_v24 = vld [vmem:[#allocation7 + $0x84] ss:$16 sps:$4 sm:$0xff]   ;;  %v2861_v25 = vld [vmem:[#allocation5 + $0x70] ss:$8 sps:$4 sm:$0xff]   ;;  %v2872_v32 = vld [vmem:[#allocation7 + $0x2c] ss:$16 sps:$4 sm:$0xff]  }
  0x55   :  { %175 = vmatpush1.bf16.msra.mxu0 %v2846_v6  ;;  %607 = vmatprep.subr.bf16.mxu1 %v2874_v16  ;;  %v2891_v28 = vld [vmem:[#allocation7 + $0x80] ss:$16 sps:$4 sm:$0xff]   ;;  %v2892_v29 = vld [vmem:[#allocation7 + $0xa4] ss:$16 sps:$4 sm:$0xff]   ;;  %v2870_v35 = vld [vmem:[#allocation7 + $0x28] ss:$16 sps:$4 sm:$0xff]  }
  0x56   :  { %176 = vmatprep.subr.bf16.mxu0 %v2847_v7  ;;  %v2897_v33 = vld [vmem:[#allocation7 + $0xa0] ss:$16 sps:$4 sm:$0xff]   ;;  %v2898_v34 = vld [vmem:[#allocation7 + $0xc4] ss:$16 sps:$4 sm:$0xff]   ;;  %v2878_v36 = vld [vmem:[#allocation7 + $0x4c] ss:$16 sps:$4 sm:$0xff]  }
  0x57   :  { %v2903_v37 = vld [vmem:[#allocation7 + $0xc0] ss:$16 sps:$4 sm:$0xff]   ;;  %v2904_v38 = vld [vmem:[#allocation7 + $0xe4] ss:$16 sps:$4 sm:$0xff]   ;;  %v2876_v39 = vld [vmem:[#allocation7 + $0x48] ss:$16 sps:$4 sm:$0xff]  }
  0x58   :  { %608 = vmatpush1.bf16.msra.mxu1 %v2879_v19  ;;  %v2884_v40 = vld [vmem:[#allocation7 + $0x6c] ss:$16 sps:$4 sm:$0xff]   ;;  %v2909_v41 = vld [vmem:[#allocation7 + $0xe0] ss:$16 sps:$4 sm:$0xff]   ;;  %v2910_v42 = vld [vmem:[#allocation7 + $0x104] ss:$16 sps:$4 sm:$0xff]  }
  0x59   :  { %177 = vmatpush1.bf16.msra.mxu0 %v2849_v8  ;;  %609 = vmatprep.subr.bf16.mxu1 %v2880_v20  ;;  %v2882_v43 = vld [vmem:[#allocation7 + $0x68] ss:$16 sps:$4 sm:$0xff]   ;;  %v2890_v44 = vld [vmem:[#allocation7 + $0x8c] ss:$16 sps:$4 sm:$0xff]   ;;  %v2915_v45 = vld [vmem:[#allocation7 + $0x100] ss:$16 sps:$4 sm:$0xff]  }
  0x5a   :  { %178 = vmatprep.subr.bf16.mxu0 %v2850_v10  ;;  %v2916_v46 = vld [vmem:[#allocation7 + $0x124] ss:$16 sps:$4 sm:$0xff]   ;;  %v2888_v47 = vld [vmem:[#allocation7 + $0x88] ss:$16 sps:$4 sm:$0xff]   ;;  %v2896_v48 = vld [vmem:[#allocation7 + $0xac] ss:$16 sps:$4 sm:$0xff]  }
  0x5b   :  { %v2921_v49 = vld [vmem:[#allocation7 + $0x120] ss:$16 sps:$4 sm:$0xff]   ;;  %v2922_v50 = vld [vmem:[#allocation7 + $0x144] ss:$16 sps:$4 sm:$0xff]   ;;  %v2894_v51 = vld [vmem:[#allocation7 + $0xa8] ss:$16 sps:$4 sm:$0xff]  }
  0x5c   :  { %610 = vmatpush1.bf16.msra.mxu1 %v2885_v23  ;;  %v2927_v52 = vld [vmem:[#allocation7 + $0x140] ss:$16 sps:$4 sm:$0xff]   ;;  %v2902_v53 = vld [vmem:[#allocation7 + $0xcc] ss:$16 sps:$4 sm:$0xff]   ;;  %v2928_v54 = vld [vmem:[#allocation7 + $0x164] ss:$16 sps:$4 sm:$0xff]  }
  0x5d   :  { %179 = vmatpush1.bf16.msra.mxu0 %v2852_v13  ;;  %611 = vmatprep.subr.bf16.mxu1 %v2886_v24  ;;  %v2900_v55 = vld [vmem:[#allocation7 + $0xc8] ss:$16 sps:$4 sm:$0xff]   ;;  %v2933_v56 = vld [vmem:[#allocation7 + $0x160] ss:$16 sps:$4 sm:$0xff]   ;;  %v2908_v57 = vld [vmem:[#allocation7 + $0xec] ss:$16 sps:$4 sm:$0xff]  }
  0x5e   :  { %180 = vmatprep.subr.bf16.mxu0 %v2853_v14  ;;  %v2934_v58 = vld [vmem:[#allocation7 + $0x184] ss:$16 sps:$4 sm:$0xff]   ;;  %v2906_v59 = vld [vmem:[#allocation7 + $0xe8] ss:$16 sps:$4 sm:$0xff]   ;;  %v2939_v60 = vld [vmem:[#allocation7 + $0x180] ss:$16 sps:$4 sm:$0xff]  }
  0x5f   :  { %v2914_v61 = vld [vmem:[#allocation7 + $0x10c] ss:$16 sps:$4 sm:$0xff]   ;;  %v2940_v62 = vld [vmem:[#allocation7 + $0x1a4] ss:$16 sps:$4 sm:$0xff]   ;;  %v2912_v63 = vld [vmem:[#allocation7 + $0x108] ss:$16 sps:$4 sm:$0xff]  }
  0x60   :  { %612 = vmatpush1.bf16.msra.mxu1 %v2891_v28  ;;  %v2945_v0 = vld [vmem:[#allocation7 + $0x1a0] ss:$16 sps:$4 sm:$0xff]   ;;  %v2920_v1 = vld [vmem:[#allocation7 + $0x12c] ss:$16 sps:$4 sm:$0xff]   ;;  %v2918_v2 = vld [vmem:[#allocation7 + $0x128] ss:$16 sps:$4 sm:$0xff]  }
  0x61   :  { %181 = vmatpush1.bf16.msra.mxu0 %v2855_v17  ;;  %613 = vmatprep.subr.bf16.mxu1 %v2892_v29  ;;  %v2926_v3 = vld [vmem:[#allocation7 + $0x14c] ss:$16 sps:$4 sm:$0xff]   ;;  %v2924_v4 = vld [vmem:[#allocation7 + $0x148] ss:$16 sps:$4 sm:$0xff]   ;;  %v2946_v11 = vld [vmem:[#allocation7 + $0x1c4] ss:$16 sps:$4 sm:$0xff]  }
  0x62   :  { %182 = vmatprep.subr.bf16.mxu0 %v2856_v18  ;;  %v2932_v5 = vld [vmem:[#allocation7 + $0x16c] ss:$16 sps:$4 sm:$0xff]   ;;  %v2930_v6 = vld [vmem:[#allocation7 + $0x168] ss:$16 sps:$4 sm:$0xff]   ;;  %v2951_v14 = vld [vmem:[#allocation7 + $0x1c0] ss:$16 sps:$4 sm:$0xff]  }
  0x63   :  { %v2938_v7 = vld [vmem:[#allocation7 + $0x18c] ss:$16 sps:$4 sm:$0xff]   ;;  %v2936_v8 = vld [vmem:[#allocation7 + $0x188] ss:$16 sps:$4 sm:$0xff]   ;;  %v2952_v15 = vld [vmem:[#allocation7 + $0x1e4] ss:$16 sps:$4 sm:$0xff]  }
  0x64   :  { %614 = vmatpush1.bf16.msra.mxu1 %v2897_v33  ;;  %v2944_v9 = vld [vmem:[#allocation7 + $0x1ac] ss:$16 sps:$4 sm:$0xff]   ;;  %v2942_v10 = vld [vmem:[#allocation7 + $0x1a8] ss:$16 sps:$4 sm:$0xff]   ;;  %v2957_v18 = vld [vmem:[#allocation7 + $0x1e0] ss:$16 sps:$4 sm:$0xff]  }
  0x65   :  { %183 = vmatpush1.bf16.msra.mxu0 %v2858_v21  ;;  %615 = vmatprep.subr.bf16.mxu1 %v2898_v34  ;;  %v2950_v12 = vld [vmem:[#allocation7 + $0x1cc] ss:$16 sps:$4 sm:$0xff]   ;;  %v2948_v13 = vld [vmem:[#allocation7 + $0x1c8] ss:$16 sps:$4 sm:$0xff]   ;;  %v2960_v19 = vld [vmem:[#allocation8 + $0x4] ss:$28 sps:$4 sm:$0xff]  }
  0x66   :  { %184 = vmatprep.subr.bf16.mxu0 %v2859_v22  ;;  %v2956_v16 = vld [vmem:[#allocation7 + $0x1ec] ss:$16 sps:$4 sm:$0xff]   ;;  %v2954_v17 = vld [vmem:[#allocation7 + $0x1e8] ss:$16 sps:$4 sm:$0xff]   ;;  %v2969_v34 = vld [vmem:[#allocation8 + $0x44] ss:$28 sps:$4 sm:$0xff]  }
  0x67   :  { %v2963_v20 = vld [vmem:[#allocation8 + $0xc] ss:$28 sps:$4 sm:$0xff]   ;;  %v2966_v33 = vld [vmem:[#allocation8 + $0x3c] ss:$28 sps:$4 sm:$0xff]   ;;  %s3421_s3 = smov [#allocation10]  }
  0x68   :  { %616 = vmatpush1.bf16.msra.mxu1 %v2903_v37  ;;  %v2972_v37 = vld [vmem:[#allocation8 + $0x74] ss:$28 sps:$4 sm:$0xff]   ;;  %s2455_s1 = sshll.u32 %s3421_s3, 4  ;;  %s2456_s1 = int_to_ptr.vmem [resolvable:$true] %s2455_s1 }
  0x69   :  { %185 = vmatpush1.bf16.msra.mxu0 %v2861_v25  ;;  %617 = vmatprep.subr.bf16.mxu1 %v2904_v38  ;;  %v2975_v38 = vld [vmem:[#allocation8 + $0x7c] ss:$28 sps:$4 sm:$0xff]   ;;  %s3380_s14 = scalar_lea.vmem %s2456_s1, 896  ;;  %p3385_p5 = scmp.lt.s32.totalorder %s2456_s1, %s2456_s1 }
  0x6a   :  { %644 = vmatprep.subr.bf16.mxu0 %v2866_v27  ;;  %p3381_p4 = scmp.ne.s32.totalorder %s2456_s1, %s3380_s14  ;;  %p3386_p6 = scmp.lt.s32.totalorder %s3380_s14, %s3380_s14 }
  0x6c   :  { %203 = vmatmul.mubr.bf16.vlgmr.msra.gmra.mrb[0].mxu0 %v73_v30  ;;  %618 = vmatpush1.bf16.msra.mxu1 %v2909_v41  ;;  %v2958_v30 = vld [vmem:[#allocation8] ss:$28 sps:$4 sm:$0xff]   ;;  %v2978_v41 = vld [vmem:[#allocation8 + $0xac] ss:$28 sps:$4 sm:$0xff]   ;;  %p3387_p7 = por %p3386_p6, %p3385_p5 }
  0x6d   :  { %645 = vmatpush1.bf16.msra.mxu0 %v2864_v31  ;;  %619 = vmatprep.subr.bf16.mxu1 %v2910_v42  ;;  %v2961_v31 = vld [vmem:[#allocation8 + $0x8] ss:$28 sps:$4 sm:$0xff]   ;;  %v2981_v42 = vld [vmem:[#allocation8 + $0xb4] ss:$28 sps:$4 sm:$0xff]  }
  0x6e   :  { %646 = vmatprep.subr.bf16.mxu0 %v2872_v32  ;;  %p3388_p8 = pnand %p3387_p7, %p3381_p4 }
  0x70   :  { %620 = vmatpush1.bf16.msra.mxu1 %v2915_v45  ;;  %v2984_v45 = vld [vmem:[#allocation8 + $0xe4] ss:$28 sps:$4 sm:$0xff]  }
  0x71   :  { %647 = vmatpush1.bf16.msra.mxu0 %v2870_v35  ;;  %621 = vmatprep.subr.bf16.mxu1 %v2916_v46  ;;  %v2964_v35 = vld [vmem:[#allocation8 + $0x38] ss:$28 sps:$4 sm:$0xff]   ;;  %v2987_v46 = vld [vmem:[#allocation8 + $0xec] ss:$28 sps:$4 sm:$0xff]  }
  0x72   :  { %648 = vmatprep.subr.bf16.mxu0 %v2878_v36  ;;  %v2967_v36 = vld [vmem:[#allocation8 + $0x40] ss:$28 sps:$4 sm:$0xff]  }
  0x74   :  { %622 = vmatpush1.bf16.msra.mxu1 %v2921_v49  ;;  %v2990_v49 = vld [vmem:[#allocation8 + $0x11c] ss:$28 sps:$4 sm:$0xff]  }
  0x75   :  { %649 = vmatpush1.bf16.msra.mxu0 %v2876_v39  ;;  %623 = vmatprep.subr.bf16.mxu1 %v2922_v50  ;;  %v2970_v39 = vld [vmem:[#allocation8 + $0x70] ss:$28 sps:$4 sm:$0xff]   ;;  %v2993_v50 = vld [vmem:[#allocation8 + $0x124] ss:$28 sps:$4 sm:$0xff]  }
  0x76   :  { %650 = vmatprep.subr.bf16.mxu0 %v2884_v40  ;;  %v2973_v40 = vld [vmem:[#allocation8 + $0x78] ss:$28 sps:$4 sm:$0xff]  }
  0x78   :  { %624 = vmatpush1.bf16.msra.mxu1 %v2927_v52  ;;  %v2991_v52 = vld [vmem:[#allocation8 + $0x120] ss:$28 sps:$4 sm:$0xff]  }
  0x79   :  { %651 = vmatpush1.bf16.msra.mxu0 %v2882_v43  ;;  %625 = vmatprep.subr.bf16.mxu1 %v2928_v54  ;;  %v2976_v43 = vld [vmem:[#allocation8 + $0xa8] ss:$28 sps:$4 sm:$0xff]   ;;  %v2999_v54 = vld [vmem:[#allocation8 + $0x15c] ss:$28 sps:$4 sm:$0xff]  }
  0x7a   :  { %652 = vmatprep.subr.bf16.mxu0 %v2890_v44  ;;  %v2979_v44 = vld [vmem:[#allocation8 + $0xb0] ss:$28 sps:$4 sm:$0xff]  }
  0x7c   :  { %626 = vmatpush1.bf16.msra.mxu1 %v2933_v56  ;;  %v2997_v56 = vld [vmem:[#allocation8 + $0x158] ss:$28 sps:$4 sm:$0xff]  }
  0x7d   :  { %653 = vmatpush1.bf16.msra.mxu0 %v2888_v47  ;;  %627 = vmatprep.subr.bf16.mxu1 %v2934_v58  ;;  %v2982_v47 = vld [vmem:[#allocation8 + $0xe0] ss:$28 sps:$4 sm:$0xff]   ;;  %v3005_v58 = vld [vmem:[#allocation8 + $0x194] ss:$28 sps:$4 sm:$0xff]  }
  0x7e   :  { %654 = vmatprep.subr.bf16.mxu0 %v2896_v48  ;;  %v2985_v48 = vld [vmem:[#allocation8 + $0xe8] ss:$28 sps:$4 sm:$0xff]  }
  0x80   :  { %628 = vmatpush1.bf16.msra.mxu1 %v2939_v60  ;;  %v3003_v60 = vld [vmem:[#allocation8 + $0x190] ss:$28 sps:$4 sm:$0xff]  }
  0x81   :  { %655 = vmatpush1.bf16.msra.mxu0 %v2894_v51  ;;  %629 = vmatprep.subr.bf16.mxu1 %v2940_v62  ;;  %v2988_v51 = vld [vmem:[#allocation8 + $0x118] ss:$28 sps:$4 sm:$0xff]   ;;  %v3011_v62 = vld [vmem:[#allocation8 + $0x1cc] ss:$28 sps:$4 sm:$0xff]  }
  0x82   :  { %656 = vmatprep.subr.bf16.mxu0 %v2902_v53  ;;  %v2996_v53 = vld [vmem:[#allocation8 + $0x154] ss:$28 sps:$4 sm:$0xff]  }
  0x84   :  { %630 = vmatpush1.bf16.msra.mxu1 %v2945_v0  ;;  %v3009_v0 = vld [vmem:[#allocation8 + $0x1c8] ss:$28 sps:$4 sm:$0xff]  }
  0x85   :  { %657 = vmatpush1.bf16.msra.mxu0 %v2900_v55  ;;  %631 = vmatprep.subr.bf16.mxu1 %v2946_v11  ;;  %v2994_v55 = vld [vmem:[#allocation8 + $0x150] ss:$28 sps:$4 sm:$0xff]   ;;  %v3024_v11 = vld [vmem:[#allocation8 + $0x268] ss:$28 sps:$4 sm:$0xff]  }
  0x86   :  { %658 = vmatprep.subr.bf16.mxu0 %v2908_v57  ;;  %v3002_v57 = vld [vmem:[#allocation8 + $0x18c] ss:$28 sps:$4 sm:$0xff]  }
  0x88   :  { %632 = vmatpush1.bf16.msra.mxu1 %v2951_v14  ;;  %v3035_v14 = vld [vmem:[#allocation8 + $0x2ac] ss:$28 sps:$4 sm:$0xff]  }
  0x89   :  { %659 = vmatpush1.bf16.msra.mxu0 %v2906_v59  ;;  %633 = vmatprep.subr.bf16.mxu1 %v2952_v15  ;;  %v3000_v59 = vld [vmem:[#allocation8 + $0x188] ss:$28 sps:$4 sm:$0xff]   ;;  %v3030_v15 = vld [vmem:[#allocation8 + $0x2a0] ss:$28 sps:$4 sm:$0xff]  }
  0x8a   :  { %660 = vmatprep.subr.bf16.mxu0 %v2914_v61  ;;  %v3008_v61 = vld [vmem:[#allocation8 + $0x1c4] ss:$28 sps:$4 sm:$0xff]  }
  0x8c   :  { %634 = vmatpush1.bf16.msra.mxu1 %v2957_v18  ;;  %v3041_v18 = vld [vmem:[#allocation8 + $0x2e4] ss:$28 sps:$4 sm:$0xff]  }
  0x8d   :  { %661 = vmatpush1.bf16.msra.mxu0 %v2912_v63  ;;  %2109 = vmatprep.subr.bf16.mxu1 %v2960_v19  ;;  %v3006_v63 = vld [vmem:[#allocation8 + $0x1c0] ss:$28 sps:$4 sm:$0xff]   ;;  %v3036_v19 = vld [vmem:[#allocation8 + $0x2d8] ss:$28 sps:$4 sm:$0xff]  }
  0x8e   :  { %662 = vmatprep.subr.bf16.mxu0 %v2920_v1  ;;  %v3014_v1 = vld [vmem:[#allocation8 + $0x1fc] ss:$28 sps:$4 sm:$0xff]  }
  0x91   :  { %663 = vmatpush1.bf16.msra.mxu0 %v2918_v2  ;;  %v3017_v2 = vld [vmem:[#allocation8 + $0x204] ss:$28 sps:$4 sm:$0xff]  }
  0x92   :  { %664 = vmatprep.subr.bf16.mxu0 %v2926_v3  ;;  %v3012_v3 = vld [vmem:[#allocation8 + $0x1f8] ss:$28 sps:$4 sm:$0xff]  }
  0x95   :  { %665 = vmatpush1.bf16.msra.mxu0 %v2924_v4  ;;  %v3015_v4 = vld [vmem:[#allocation8 + $0x200] ss:$28 sps:$4 sm:$0xff]  }
  0x96   :  { %666 = vmatprep.subr.bf16.mxu0 %v2932_v5  ;;  %v3020_v5 = vld [vmem:[#allocation8 + $0x234] ss:$28 sps:$4 sm:$0xff]  }
  0x99   :  { %667 = vmatpush1.bf16.msra.mxu0 %v2930_v6  ;;  %v3023_v6 = vld [vmem:[#allocation8 + $0x23c] ss:$28 sps:$4 sm:$0xff]  }
  0x9a   :  { %668 = vmatprep.subr.bf16.mxu0 %v2938_v7  ;;  %v3018_v7 = vld [vmem:[#allocation8 + $0x230] ss:$28 sps:$4 sm:$0xff]  }
  0x9d   :  { %669 = vmatpush1.bf16.msra.mxu0 %v2936_v8  ;;  %v3021_v8 = vld [vmem:[#allocation8 + $0x238] ss:$28 sps:$4 sm:$0xff]  }
  0x9e   :  { %670 = vmatprep.subr.bf16.mxu0 %v2944_v9  ;;  %v3026_v9 = vld [vmem:[#allocation8 + $0x26c] ss:$28 sps:$4 sm:$0xff]  }
  0xa1   :  { %671 = vmatpush1.bf16.msra.mxu0 %v2942_v10  ;;  %v3029_v10 = vld [vmem:[#allocation8 + $0x274] ss:$28 sps:$4 sm:$0xff]  }
  0xa2   :  { %672 = vmatprep.subr.bf16.mxu0 %v2950_v12  ;;  %v3027_v12 = vld [vmem:[#allocation8 + $0x270] ss:$28 sps:$4 sm:$0xff]  }
  0xa5   :  { %673 = vmatpush1.bf16.msra.mxu0 %v2948_v13  ;;  %v3032_v13 = vld [vmem:[#allocation8 + $0x2a4] ss:$28 sps:$4 sm:$0xff]  }
  0xa6   :  { %674 = vmatprep.subr.bf16.mxu0 %v2956_v16  ;;  %v3033_v16 = vld [vmem:[#allocation8 + $0x2a8] ss:$28 sps:$4 sm:$0xff]  }
  0xa9   :  { %675 = vmatpush1.bf16.msra.mxu0 %v2954_v17  ;;  %v3038_v17 = vld [vmem:[#allocation8 + $0x2dc] ss:$28 sps:$4 sm:$0xff]  }
  0xaa   :  { %2191 = vmatprep.subr.bf16.mxu0 %v2963_v20  ;;  %v3039_v20 = vld [vmem:[#allocation8 + $0x2e0] ss:$28 sps:$4 sm:$0xff]  }
 0x13f   :  { %v204_v21 = vpop.f32.mrb[0].mxu0 }
 0x140   :  { %vm211_vm0 = vcmp.gt.f32.partialorder %v204_v21, 0.0  ;;  %v213_v22 = vmul.f32 0.2, %v204_v21  ;;  %v206_v23 = vpop.f32.mrb[1].mxu0 }
 0x141   :  { %vm212_vm1 = vcmp.gt.f32.partialorder %v206_v23, 0.0  ;;  %v214_v24 = vmul.f32 0.2, %v206_v23  ;;  %v208_v25 = vpop.f32.mrb[2].mxu0 }
 0x142   :  { %v215_v26 = vsel %vm211_vm0, %v204_v21, %v213_v22  ;;  %v209_v27 = vpop.f32.mrb[3].mxu0  ;;  %v3044_v21 = vld [vmem:[#allocation8 + $0x314] ss:$28 sps:$4 sm:$0xff]   ;;  %v3047_v22 = vld [vmem:[#allocation8 + $0x31c] ss:$28 sps:$4 sm:$0xff]  }
 0x143   :  { %v216_v28 = vsel %vm212_vm1, %v206_v23, %v214_v24  ;;  %v217_v32 = vpack.c.bf16 %v215_v26, %v215_v26  ;;  %v3042_v23 = vld [vmem:[#allocation8 + $0x310] ss:$28 sps:$4 sm:$0xff]   ;;  %v3045_v24 = vld [vmem:[#allocation8 + $0x318] ss:$28 sps:$4 sm:$0xff]   ;;  %v3048_v27 = vld [vmem:[#allocation8 + $0x348] ss:$28 sps:$4 sm:$0xff]  }
 0x144   :  { %v218_v29 = vpack.c.bf16 %v216_v28, %v216_v28  ;;  %v3050_v25 = vld [vmem:[#allocation8 + $0x34c] ss:$28 sps:$4 sm:$0xff]   ;;  %v3053_v26 = vld [vmem:[#allocation8 + $0x354] ss:$28 sps:$4 sm:$0xff]  }
 0x145   :  { %v3051_v28 = vld [vmem:[#allocation8 + $0x350] ss:$28 sps:$4 sm:$0xff]  }
 0x146   :  { %635 = vmatprep.mubr.bf16.mxu1 %v218_v29  ;;  %676 = vmatprep.mubr.bf16.mxu0 %v218_v29  ;;  %v3056_v29 = vld [vmem:[#allocation8 + $0x384] ss:$28 sps:$4 sm:$0xff]  }
 0x147   :  { %636 = vmatmul.mubr.bf16.vlgmr.msra.gmra.mrb[0].mxu1 %v217_v32  ;;  %677 = vmatmul.mubr.bf16.vlgmr.msra.gmra.mrb[4].mxu0 %v217_v32 }
 0x148   :  { %2110 = vmatpush1.bf16.msra.mxu1 %v2958_v30  ;;  %2192 = vmatpush1.bf16.msra.mxu0 %v2961_v31  ;;  %v3059_v30 = vld [vmem:[#allocation8 + $0x38c] ss:$28 sps:$4 sm:$0xff]  }
 0x149   :  { %2111 = vmatprep.subr.bf16.mxu1 %v2966_v33  ;;  %2193 = vmatprep.subr.bf16.mxu0 %v2969_v34 }
 0x14c   :  { %2112 = vmatpush1.bf16.msra.mxu1 %v2964_v35  ;;  %2194 = vmatpush1.bf16.msra.mxu0 %v2967_v36 }
 0x14d   :  { %2113 = vmatprep.subr.bf16.mxu1 %v2972_v37  ;;  %2195 = vmatprep.subr.bf16.mxu0 %v2975_v38 }
 0x150   :  { %2114 = vmatpush1.bf16.msra.mxu1 %v2970_v39  ;;  %2196 = vmatpush1.bf16.msra.mxu0 %v2973_v40 }
 0x151   :  { %2115 = vmatprep.subr.bf16.mxu1 %v2978_v41  ;;  %2197 = vmatprep.subr.bf16.mxu0 %v2981_v42 }
 0x154   :  { %2116 = vmatpush1.bf16.msra.mxu1 %v2976_v43  ;;  %2198 = vmatpush1.bf16.msra.mxu0 %v2979_v44 }
 0x155   :  { %2117 = vmatprep.subr.bf16.mxu1 %v2984_v45  ;;  %2199 = vmatprep.subr.bf16.mxu0 %v2987_v46  ;;  %v3054_v46 = vld [vmem:[#allocation8 + $0x380] ss:$28 sps:$4 sm:$0xff]  }
 0x158   :  { %2118 = vmatpush1.bf16.msra.mxu1 %v2982_v47  ;;  %2200 = vmatpush1.bf16.msra.mxu0 %v2985_v48  ;;  %v3057_v47 = vld [vmem:[#allocation8 + $0x388] ss:$28 sps:$4 sm:$0xff]  }
 0x159   :  { %2119 = vmatprep.subr.bf16.mxu1 %v2990_v49  ;;  %2201 = vmatprep.subr.bf16.mxu0 %v2993_v50  ;;  %v3062_v49 = vld [vmem:[#allocation8 + $0x3bc] ss:$28 sps:$4 sm:$0xff]   ;;  %v3065_v50 = vld [vmem:[#allocation8 + $0x3c4] ss:$28 sps:$4 sm:$0xff]  }
 0x15c   :  { %2120 = vmatpush1.bf16.msra.mxu1 %v2988_v51  ;;  %2202 = vmatpush1.bf16.msra.mxu0 %v2991_v52  ;;  %v3060_v52 = vld [vmem:[#allocation8 + $0x3b8] ss:$28 sps:$4 sm:$0xff]  }
 0x15d   :  { %2121 = vmatprep.subr.bf16.mxu1 %v2996_v53  ;;  %2203 = vmatprep.subr.bf16.mxu0 %v2999_v54  ;;  %v3063_v53 = vld [vmem:[#allocation8 + $0x3c0] ss:$28 sps:$4 sm:$0xff]   ;;  %v3068_v54 = vld [vmem:[#allocation8 + $0x3f4] ss:$28 sps:$4 sm:$0xff]  }
 0x160   :  { %2122 = vmatpush1.bf16.msra.mxu1 %v2994_v55  ;;  %2204 = vmatpush1.bf16.msra.mxu0 %v2997_v56  ;;  %v3071_v55 = vld [vmem:[#allocation8 + $0x3fc] ss:$28 sps:$4 sm:$0xff]   ;;  %v3066_v56 = vld [vmem:[#allocation8 + $0x3f0] ss:$28 sps:$4 sm:$0xff]  }
 0x161   :  { %2123 = vmatprep.subr.bf16.mxu1 %v3002_v57  ;;  %2205 = vmatprep.subr.bf16.mxu0 %v3005_v58  ;;  %v3069_v57 = vld [vmem:[#allocation8 + $0x3f8] ss:$28 sps:$4 sm:$0xff]   ;;  %v3074_v58 = vld [vmem:[#allocation8 + $0x42c] ss:$28 sps:$4 sm:$0xff]  }
 0x164   :  { %2124 = vmatpush1.bf16.msra.mxu1 %v3000_v59  ;;  %2206 = vmatpush1.bf16.msra.mxu0 %v3003_v60  ;;  %v3077_v59 = vld [vmem:[#allocation8 + $0x434] ss:$28 sps:$4 sm:$0xff]   ;;  %v3072_v60 = vld [vmem:[#allocation8 + $0x428] ss:$28 sps:$4 sm:$0xff]  }
 0x165   :  { %2125 = vmatprep.subr.bf16.mxu1 %v3008_v61  ;;  %2207 = vmatprep.subr.bf16.mxu0 %v3011_v62  ;;  %v3075_v61 = vld [vmem:[#allocation8 + $0x430] ss:$28 sps:$4 sm:$0xff]   ;;  %v3080_v62 = vld [vmem:[#allocation8 + $0x464] ss:$28 sps:$4 sm:$0xff]  }
 0x168   :  { %2126 = vmatpush1.bf16.msra.mxu1 %v3006_v63  ;;  %2208 = vmatpush1.bf16.msra.mxu0 %v3009_v0  ;;  %v3083_v63 = vld [vmem:[#allocation8 + $0x46c] ss:$28 sps:$4 sm:$0xff]   ;;  %v3078_v0 = vld [vmem:[#allocation8 + $0x460] ss:$28 sps:$4 sm:$0xff]  }
 0x169   :  { %2127 = vmatprep.subr.bf16.mxu1 %v3014_v1  ;;  %2209 = vmatprep.subr.bf16.mxu0 %v3017_v2  ;;  %v3081_v1 = vld [vmem:[#allocation8 + $0x468] ss:$28 sps:$4 sm:$0xff]   ;;  %v3086_v2 = vld [vmem:[#allocation8 + $0x49c] ss:$28 sps:$4 sm:$0xff]  }
 0x16c   :  { %2128 = vmatpush1.bf16.msra.mxu1 %v3012_v3  ;;  %2210 = vmatpush1.bf16.msra.mxu0 %v3015_v4  ;;  %v3089_v3 = vld [vmem:[#allocation8 + $0x4a4] ss:$28 sps:$4 sm:$0xff]   ;;  %v3084_v4 = vld [vmem:[#allocation8 + $0x498] ss:$28 sps:$4 sm:$0xff]  }
 0x16d   :  { %2129 = vmatprep.subr.bf16.mxu1 %v3020_v5  ;;  %2211 = vmatprep.subr.bf16.mxu0 %v3023_v6  ;;  %v3087_v5 = vld [vmem:[#allocation8 + $0x4a0] ss:$28 sps:$4 sm:$0xff]   ;;  %v3092_v6 = vld [vmem:[#allocation8 + $0x4d4] ss:$28 sps:$4 sm:$0xff]  }
 0x170   :  { %2130 = vmatpush1.bf16.msra.mxu1 %v3018_v7  ;;  %2212 = vmatpush1.bf16.msra.mxu0 %v3021_v8  ;;  %v3095_v7 = vld [vmem:[#allocation8 + $0x4dc] ss:$28 sps:$4 sm:$0xff]   ;;  %v3090_v8 = vld [vmem:[#allocation8 + $0x4d0] ss:$28 sps:$4 sm:$0xff]  }
 0x171   :  { %2131 = vmatprep.subr.bf16.mxu1 %v3026_v9  ;;  %2213 = vmatprep.subr.bf16.mxu0 %v3029_v10  ;;  %v3093_v9 = vld [vmem:[#allocation8 + $0x4d8] ss:$28 sps:$4 sm:$0xff]   ;;  %v3098_v10 = vld [vmem:[#allocation8 + $0x50c] ss:$28 sps:$4 sm:$0xff]  }
 0x174   :  { %2132 = vmatpush1.bf16.msra.mxu1 %v3024_v11  ;;  %2214 = vmatpush1.bf16.msra.mxu0 %v3027_v12  ;;  %v3101_v11 = vld [vmem:[#allocation8 + $0x514] ss:$28 sps:$4 sm:$0xff]   ;;  %v3096_v12 = vld [vmem:[#allocation8 + $0x508] ss:$28 sps:$4 sm:$0xff]  }
 0x175   :  { %2133 = vmatprep.subr.bf16.mxu1 %v3032_v13  ;;  %2215 = vmatprep.subr.bf16.mxu0 %v3035_v14  ;;  %v3099_v13 = vld [vmem:[#allocation8 + $0x510] ss:$28 sps:$4 sm:$0xff]   ;;  %v3104_v14 = vld [vmem:[#allocation8 + $0x544] ss:$28 sps:$4 sm:$0xff]  }
 0x178   :  { %2134 = vmatpush1.bf16.msra.mxu1 %v3030_v15  ;;  %2216 = vmatpush1.bf16.msra.mxu0 %v3033_v16  ;;  %v3107_v15 = vld [vmem:[#allocation8 + $0x54c] ss:$28 sps:$4 sm:$0xff]   ;;  %v3102_v16 = vld [vmem:[#allocation8 + $0x540] ss:$28 sps:$4 sm:$0xff]  }
 0x179   :  { %2135 = vmatprep.subr.bf16.mxu1 %v3038_v17  ;;  %2217 = vmatprep.subr.bf16.mxu0 %v3041_v18  ;;  %v3105_v17 = vld [vmem:[#allocation8 + $0x548] ss:$28 sps:$4 sm:$0xff]   ;;  %v3110_v18 = vld [vmem:[#allocation8 + $0x57c] ss:$28 sps:$4 sm:$0xff]  }
 0x17c   :  { %2136 = vmatpush1.bf16.msra.mxu1 %v3036_v19  ;;  %2218 = vmatpush1.bf16.msra.mxu0 %v3039_v20  ;;  %v3113_v19 = vld [vmem:[#allocation8 + $0x584] ss:$28 sps:$4 sm:$0xff]   ;;  %v3108_v20 = vld [vmem:[#allocation8 + $0x578] ss:$28 sps:$4 sm:$0xff]  }
 0x17d   :  { %2137 = vmatprep.subr.bf16.mxu1 %v3044_v21  ;;  %2219 = vmatprep.subr.bf16.mxu0 %v3047_v22  ;;  %v3111_v21 = vld [vmem:[#allocation8 + $0x580] ss:$28 sps:$4 sm:$0xff]   ;;  %v3116_v22 = vld [vmem:[#allocation8 + $0x5b4] ss:$28 sps:$4 sm:$0xff]  }
 0x180   :  { %2138 = vmatpush1.bf16.msra.mxu1 %v3042_v23  ;;  %2220 = vmatpush1.bf16.msra.mxu0 %v3045_v24  ;;  %v3119_v23 = vld [vmem:[#allocation8 + $0x5bc] ss:$28 sps:$4 sm:$0xff]   ;;  %v3114_v24 = vld [vmem:[#allocation8 + $0x5b0] ss:$28 sps:$4 sm:$0xff]  }
 0x181   :  { %2139 = vmatprep.subr.bf16.mxu1 %v3050_v25  ;;  %2221 = vmatprep.subr.bf16.mxu0 %v3053_v26  ;;  %v3117_v25 = vld [vmem:[#allocation8 + $0x5b8] ss:$28 sps:$4 sm:$0xff]   ;;  %v3122_v26 = vld [vmem:[#allocation8 + $0x5ec] ss:$28 sps:$4 sm:$0xff]  }
 0x184   :  { %2140 = vmatpush1.bf16.msra.mxu1 %v3048_v27  ;;  %2222 = vmatpush1.bf16.msra.mxu0 %v3051_v28  ;;  %v3125_v27 = vld [vmem:[#allocation8 + $0x5f4] ss:$28 sps:$4 sm:$0xff]   ;;  %v3120_v28 = vld [vmem:[#allocation8 + $0x5e8] ss:$28 sps:$4 sm:$0xff]  }
 0x185   :  { %2150 = vmatprep.subr.bf16.mxu1 %v3056_v29  ;;  %2232 = vmatprep.subr.bf16.mxu0 %v3059_v30  ;;  %v3123_v29 = vld [vmem:[#allocation8 + $0x5f0] ss:$28 sps:$4 sm:$0xff]   ;;  %v3128_v30 = vld [vmem:[#allocation8 + $0x624] ss:$28 sps:$4 sm:$0xff]  }
 0x21a   :  { %v637_v31 = vpop.f32.mrb[0].mxu1  ;;  %v3495_v32 = vpop.f32.mrb[4].mxu0 }
 0x21b   :  { %vm685_vm2 = vcmp.gt.f32.partialorder %v637_v31, 0.0  ;;  %v689_v33 = vmul.f32 0.2, %v637_v31  ;;  %v639_v34 = vpop.f32.mrb[1].mxu1  ;;  %v680_v35 = vpop.f32.mrb[5].mxu0  ;;  %vm687_vm5 = vcmp.gt.f32.partialorder %v3495_v32, 0.0 }
 0x21c   :  { %vm686_vm3 = vcmp.gt.f32.partialorder %v639_v34, 0.0  ;;  %v690_v36 = vmul.f32 0.2, %v639_v34  ;;  %v641_v37 = vpop.f32.mrb[2].mxu1  ;;  %v682_v38 = vpop.f32.mrb[6].mxu0  ;;  %vm688_vm4 = vcmp.gt.f32.partialorder %v680_v35, 0.0 }
 0x21d   :  { %v693_v39 = vsel %vm685_vm2, %v637_v31, %v689_v33  ;;  %v692_v40 = vmul.f32 0.2, %v680_v35  ;;  %v642_v41 = vpop.f32.mrb[3].mxu1  ;;  %v683_v42 = vpop.f32.mrb[7].mxu0  ;;  %v3131_v31 = vld [vmem:[#allocation8 + $0x62c] ss:$28 sps:$4 sm:$0xff]  }
 0x21e   :  { %v694_v43 = vsel %vm686_vm3, %v639_v34, %v690_v36  ;;  %v3499_v48 = vpack.c.bf16 %v693_v39, %v693_v39  ;;  %v3126_v33 = vld [vmem:[#allocation8 + $0x620] ss:$28 sps:$4 sm:$0xff]   ;;  %v3129_v34 = vld [vmem:[#allocation8 + $0x628] ss:$28 sps:$4 sm:$0xff]   ;;  %v3132_v37 = vld [vmem:[#allocation8 + $0x658] ss:$28 sps:$4 sm:$0xff]  }
 0x21f   :  { %v3497_v44 = vpack.c.bf16 %v694_v43, %v694_v43  ;;  %v696_v45 = vsel %vm688_vm4, %v680_v35, %v692_v40  ;;  %v3134_v35 = vld [vmem:[#allocation8 + $0x65c] ss:$28 sps:$4 sm:$0xff]   ;;  %v3137_v36 = vld [vmem:[#allocation8 + $0x664] ss:$28 sps:$4 sm:$0xff]   ;;  %v3140_v39 = vld [vmem:[#allocation8 + $0x694] ss:$28 sps:$4 sm:$0xff]  }
 0x220   :  { %v3503_v51 = vpack.c.bf16 %v696_v45, %v696_v45  ;;  %v3135_v38 = vld [vmem:[#allocation8 + $0x660] ss:$28 sps:$4 sm:$0xff]   ;;  %v3138_v41 = vld [vmem:[#allocation8 + $0x690] ss:$28 sps:$4 sm:$0xff]   ;;  %v3141_v42 = vld [vmem:[#allocation8 + $0x698] ss:$28 sps:$4 sm:$0xff]  }
 0x221   :  { %2141 = vmatprep.mubr.bf16.mxu1 %v3497_v44  ;;  %2223 = vmatprep.mubr.bf16.mxu0 %v3497_v44  ;;  %v3143_v40 = vld [vmem:[#allocation8 + $0x69c] ss:$28 sps:$4 sm:$0xff]   ;;  %v3146_v43 = vld [vmem:[#allocation8 + $0x6cc] ss:$28 sps:$4 sm:$0xff]   ;;  %v3149_v45 = vld [vmem:[#allocation8 + $0x6d4] ss:$28 sps:$4 sm:$0xff]  }
 0x222   :  { %2142 = vmatmul.mubr.bf16.vlgmr.msra.gmra.mrb[4].mxu1 %v3499_v48  ;;  %2224 = vmatmul.mubr.bf16.vlgmr.msra.gmra.mrb[8].mxu0 %v3499_v48 }
 0x223   :  { %2151 = vmatpush1.bf16.msra.mxu1 %v3054_v46  ;;  %2233 = vmatpush1.bf16.msra.mxu0 %v3057_v47  ;;  %v691_v46 = vmul.f32 0.2, %v3495_v32  ;;  %v3144_v47 = vld [vmem:[#allocation8 + $0x6c8] ss:$28 sps:$4 sm:$0xff]  }
 0x224   :  { %2182 = vmatprep.mubr.bf16.mxu1 %v3503_v51  ;;  %2264 = vmatprep.mubr.bf16.mxu0 %v3503_v51 }
 0x225   :  { %2152 = vmatprep.subr.bf16.mxu1 %v3062_v49  ;;  %2234 = vmatprep.subr.bf16.mxu0 %v3065_v50  ;;  %v3147_v49 = vld [vmem:[#allocation8 + $0x6d0] ss:$28 sps:$4 sm:$0xff]  }
 0x226   :  { %v3152_v50 = vld [vmem:[#allocation8 + $0x14] ss:$28 sps:$4 sm:$0xff]  }
 0x227   :  { %2153 = vmatpush1.bf16.msra.mxu1 %v3060_v52  ;;  %2235 = vmatpush1.bf16.msra.mxu0 %v3063_v53  ;;  %v3153_v52 = vld [vmem:[#allocation8 + $0x1d8] ss:$28 sps:$4 sm:$0xff]   ;;  %v695_v53 = vsel %vm687_vm5, %v3495_v32, %v691_v46  ;;  %v3159_v32 = vld [vmem:[#allocation8 + $0x50] ss:$28 sps:$4 sm:$0xff]   ;;  %v3223_v46 = vld [vmem:[#allocation8 + $0x6a8] ss:$28 sps:$4 sm:$0xff]  }
 0x228   :  { %2154 = vmatprep.subr.bf16.mxu1 %v3068_v54  ;;  %2236 = vmatprep.subr.bf16.mxu0 %v3071_v55  ;;  %v3150_v54 = vld [vmem:[#allocation8 + $0x10] ss:$28 sps:$4 sm:$0xff]   ;;  %v3512_v55 = vpack.c.bf16 %v695_v53, %v695_v53  ;;  %v3225_v53 = vld [vmem:[#allocation8 + $0x358] ss:$28 sps:$4 sm:$0xff]  }
 0x22b   :  { %2155 = vmatpush1.bf16.msra.mxu1 %v3066_v56  ;;  %2237 = vmatpush1.bf16.msra.mxu0 %v3069_v57  ;;  %v3154_v56 = vld [vmem:[#allocation8 + $0x18] ss:$28 sps:$4 sm:$0xff]   ;;  %v3157_v57 = vld [vmem:[#allocation8 + $0x4c] ss:$28 sps:$4 sm:$0xff]  }
 0x22c   :  { %2156 = vmatprep.subr.bf16.mxu1 %v3074_v58  ;;  %2238 = vmatprep.subr.bf16.mxu0 %v3077_v59  ;;  %v3158_v58 = vld [vmem:[#allocation8 + $0x210] ss:$28 sps:$4 sm:$0xff]   ;;  %v3155_v59 = vld [vmem:[#allocation8 + $0x48] ss:$28 sps:$4 sm:$0xff]  }
 0x22f   :  { %2157 = vmatpush1.bf16.msra.mxu1 %v3072_v60  ;;  %2239 = vmatpush1.bf16.msra.mxu0 %v3075_v61  ;;  %v3162_v60 = vld [vmem:[#allocation8 + $0x84] ss:$28 sps:$4 sm:$0xff]  }
 0x230   :  { %2158 = vmatprep.subr.bf16.mxu1 %v3080_v62  ;;  %2240 = vmatprep.subr.bf16.mxu0 %v3083_v63  ;;  %v3163_v61 = vld [vmem:[#allocation8 + $0x248] ss:$28 sps:$4 sm:$0xff]   ;;  %v3160_v62 = vld [vmem:[#allocation8 + $0x80] ss:$28 sps:$4 sm:$0xff]  }
 0x231   :  { %v3164_v63 = vld [vmem:[#allocation8 + $0x88] ss:$28 sps:$4 sm:$0xff]  }
 0x233   :  { %2159 = vmatpush1.bf16.msra.mxu1 %v3078_v0  ;;  %2241 = vmatpush1.bf16.msra.mxu0 %v3081_v1  ;;  %v3167_v0 = vld [vmem:[#allocation8 + $0xbc] ss:$28 sps:$4 sm:$0xff]  }
 0x234   :  { %2160 = vmatprep.subr.bf16.mxu1 %v3086_v2  ;;  %2242 = vmatprep.subr.bf16.mxu0 %v3089_v3  ;;  %v3168_v1 = vld [vmem:[#allocation8 + $0x280] ss:$28 sps:$4 sm:$0xff]   ;;  %v3165_v2 = vld [vmem:[#allocation8 + $0xb8] ss:$28 sps:$4 sm:$0xff]  }
 0x235   :  { %v3169_v3 = vld [vmem:[#allocation8 + $0xc0] ss:$28 sps:$4 sm:$0xff]  }
 0x237   :  { %2161 = vmatpush1.bf16.msra.mxu1 %v3084_v4  ;;  %2243 = vmatpush1.bf16.msra.mxu0 %v3087_v5  ;;  %v3172_v4 = vld [vmem:[#allocation8 + $0xf4] ss:$28 sps:$4 sm:$0xff]  }
 0x238   :  { %2162 = vmatprep.subr.bf16.mxu1 %v3092_v6  ;;  %2244 = vmatprep.subr.bf16.mxu0 %v3095_v7  ;;  %v3170_v5 = vld [vmem:[#allocation8 + $0xf0] ss:$28 sps:$4 sm:$0xff]   ;;  %v3174_v6 = vld [vmem:[#allocation8 + $0xf8] ss:$28 sps:$4 sm:$0xff]  }
 0x239   :  { %v3177_v7 = vld [vmem:[#allocation8 + $0x12c] ss:$28 sps:$4 sm:$0xff]  }
 0x23b   :  { %2163 = vmatpush1.bf16.msra.mxu1 %v3090_v8  ;;  %2245 = vmatpush1.bf16.msra.mxu0 %v3093_v9  ;;  %v3178_v8 = vld [vmem:[#allocation8 + $0x2f0] ss:$28 sps:$4 sm:$0xff]   ;;  %v3175_v9 = vld [vmem:[#allocation8 + $0x128] ss:$28 sps:$4 sm:$0xff]  }
 0x23c   :  { %2164 = vmatprep.subr.bf16.mxu1 %v3098_v10  ;;  %2246 = vmatprep.subr.bf16.mxu0 %v3101_v11  ;;  %v3179_v10 = vld [vmem:[#allocation8 + $0x130] ss:$28 sps:$4 sm:$0xff]   ;;  %v3182_v11 = vld [vmem:[#allocation8 + $0x164] ss:$28 sps:$4 sm:$0xff]  }
 0x23f   :  { %2165 = vmatpush1.bf16.msra.mxu1 %v3096_v12  ;;  %2247 = vmatpush1.bf16.msra.mxu0 %v3099_v13  ;;  %v3183_v12 = vld [vmem:[#allocation8 + $0x328] ss:$28 sps:$4 sm:$0xff]   ;;  %v3180_v13 = vld [vmem:[#allocation8 + $0x160] ss:$28 sps:$4 sm:$0xff]  }
 0x240   :  { %2166 = vmatprep.subr.bf16.mxu1 %v3104_v14  ;;  %2248 = vmatprep.subr.bf16.mxu0 %v3107_v15  ;;  %v3184_v14 = vld [vmem:[#allocation8 + $0x168] ss:$28 sps:$4 sm:$0xff]   ;;  %v3187_v15 = vld [vmem:[#allocation8 + $0x19c] ss:$28 sps:$4 sm:$0xff]  }
 0x243   :  { %2167 = vmatpush1.bf16.msra.mxu1 %v3102_v16  ;;  %2249 = vmatpush1.bf16.msra.mxu0 %v3105_v17  ;;  %v3188_v16 = vld [vmem:[#allocation8 + $0x360] ss:$28 sps:$4 sm:$0xff]   ;;  %v3185_v17 = vld [vmem:[#allocation8 + $0x198] ss:$28 sps:$4 sm:$0xff]  }
 0x244   :  { %2168 = vmatprep.subr.bf16.mxu1 %v3110_v18  ;;  %2250 = vmatprep.subr.bf16.mxu0 %v3113_v19  ;;  %v3189_v18 = vld [vmem:[#allocation8 + $0x1a0] ss:$28 sps:$4 sm:$0xff]   ;;  %v3192_v19 = vld [vmem:[#allocation8 + $0x1d4] ss:$28 sps:$4 sm:$0xff]  }
 0x247   :  { %2169 = vmatpush1.bf16.msra.mxu1 %v3108_v20  ;;  %2251 = vmatpush1.bf16.msra.mxu0 %v3111_v21  ;;  %v3193_v20 = vld [vmem:[#allocation8 + $0x558] ss:$28 sps:$4 sm:$0xff]   ;;  %v3190_v21 = vld [vmem:[#allocation8 + $0x1d0] ss:$28 sps:$4 sm:$0xff]  }
 0x248   :  { %2170 = vmatprep.subr.bf16.mxu1 %v3116_v22  ;;  %2252 = vmatprep.subr.bf16.mxu0 %v3119_v23  ;;  %v3194_v22 = vld [vmem:[#allocation8 + $0x398] ss:$28 sps:$4 sm:$0xff]   ;;  %v3197_v23 = vld [vmem:[#allocation8 + $0x20c] ss:$28 sps:$4 sm:$0xff]  }
 0x24b   :  { %2171 = vmatpush1.bf16.msra.mxu1 %v3114_v24  ;;  %2253 = vmatpush1.bf16.msra.mxu0 %v3117_v25  ;;  %v3198_v24 = vld [vmem:[#allocation8 + $0x590] ss:$28 sps:$4 sm:$0xff]   ;;  %v3195_v25 = vld [vmem:[#allocation8 + $0x208] ss:$28 sps:$4 sm:$0xff]  }
 0x24c   :  { %2172 = vmatprep.subr.bf16.mxu1 %v3122_v26  ;;  %2254 = vmatprep.subr.bf16.mxu0 %v3125_v27  ;;  %v3199_v26 = vld [vmem:[#allocation8 + $0x3d0] ss:$28 sps:$4 sm:$0xff]   ;;  %v3202_v27 = vld [vmem:[#allocation8 + $0x244] ss:$28 sps:$4 sm:$0xff]  }
 0x24f   :  { %2173 = vmatpush1.bf16.msra.mxu1 %v3120_v28  ;;  %2255 = vmatpush1.bf16.msra.mxu0 %v3123_v29  ;;  %v3203_v28 = vld [vmem:[#allocation8 + $0x5c8] ss:$28 sps:$4 sm:$0xff]   ;;  %v3200_v29 = vld [vmem:[#allocation8 + $0x240] ss:$28 sps:$4 sm:$0xff]  }
 0x250   :  { %2174 = vmatprep.subr.bf16.mxu1 %v3128_v30  ;;  %2256 = vmatprep.subr.bf16.mxu0 %v3131_v31  ;;  %v3204_v30 = vld [vmem:[#allocation8 + $0x408] ss:$28 sps:$4 sm:$0xff]   ;;  %v3207_v31 = vld [vmem:[#allocation8 + $0x27c] ss:$28 sps:$4 sm:$0xff]  }
 0x253   :  { %2175 = vmatpush1.bf16.msra.mxu1 %v3126_v33  ;;  %2257 = vmatpush1.bf16.msra.mxu0 %v3129_v34  ;;  %v3208_v33 = vld [vmem:[#allocation8 + $0x600] ss:$28 sps:$4 sm:$0xff]   ;;  %v3205_v34 = vld [vmem:[#allocation8 + $0x278] ss:$28 sps:$4 sm:$0xff]  }
 0x254   :  { %2176 = vmatprep.subr.bf16.mxu1 %v3134_v35  ;;  %2258 = vmatprep.subr.bf16.mxu0 %v3137_v36  ;;  %v3209_v35 = vld [vmem:[#allocation8 + $0x440] ss:$28 sps:$4 sm:$0xff]   ;;  %v3212_v36 = vld [vmem:[#allocation8 + $0x2b4] ss:$28 sps:$4 sm:$0xff]  }
 0x257   :  { %2177 = vmatpush1.bf16.msra.mxu1 %v3132_v37  ;;  %2259 = vmatpush1.bf16.msra.mxu0 %v3135_v38  ;;  %v3213_v37 = vld [vmem:[#allocation8 + $0x638] ss:$28 sps:$4 sm:$0xff]   ;;  %v3210_v38 = vld [vmem:[#allocation8 + $0x2b0] ss:$28 sps:$4 sm:$0xff]  }
 0x258   :  { %2178 = vmatprep.subr.bf16.mxu1 %v3140_v39  ;;  %2260 = vmatprep.subr.bf16.mxu0 %v3143_v40  ;;  %v3214_v39 = vld [vmem:[#allocation8 + $0x478] ss:$28 sps:$4 sm:$0xff]   ;;  %v3217_v40 = vld [vmem:[#allocation8 + $0x2ec] ss:$28 sps:$4 sm:$0xff]  }
 0x25b   :  { %2179 = vmatpush1.bf16.msra.mxu1 %v3138_v41  ;;  %2261 = vmatpush1.bf16.msra.mxu0 %v3141_v42  ;;  %v3218_v41 = vld [vmem:[#allocation8 + $0x670] ss:$28 sps:$4 sm:$0xff]   ;;  %v3215_v42 = vld [vmem:[#allocation8 + $0x2e8] ss:$28 sps:$4 sm:$0xff]  }
 0x25c   :  { %2180 = vmatprep.subr.bf16.mxu1 %v3146_v43  ;;  %2262 = vmatprep.subr.bf16.mxu0 %v3149_v45  ;;  %v3219_v43 = vld [vmem:[#allocation8 + $0x4b0] ss:$28 sps:$4 sm:$0xff]   ;;  %v3222_v45 = vld [vmem:[#allocation8 + $0x324] ss:$28 sps:$4 sm:$0xff]  }
 0x25f   :  { %2181 = vmatpush1.bf16.msra.mxu1 %v3144_v47  ;;  %2263 = vmatpush1.bf16.msra.mxu0 %v3147_v49  ;;  %v3220_v47 = vld [vmem:[#allocation8 + $0x320] ss:$28 sps:$4 sm:$0xff]   ;;  %v3224_v49 = vld [vmem:[#allocation8 + $0x4e8] ss:$28 sps:$4 sm:$0xff]  }
 0x260   :  { %2273 = vmatprep.subr.bf16.mxu1 %v3152_v50  ;;  %2770 = vmatprep.subr.bf16.mxu0 %v3153_v52  ;;  %v3227_v50 = vld [vmem:[#allocation8 + $0x35c] ss:$28 sps:$4 sm:$0xff]  }
 0x261   :  { %v3228_v52 = vld [vmem:[#allocation8 + $0x6e0] ss:$28 sps:$4 sm:$0xff]  }
 0x262   :  { %2183 = vmatmul.mubr.bf16.vlgmr.msra.gmra.mrb[4].mxu1 %v3512_v55  ;;  %2265 = vmatmul.mubr.bf16.vlgmr.msra.gmra.mrb[8].mxu0 %v3512_v55 }
 0x263   :  { %2274 = vmatpush1.bf16.msra.mxu1 %v3150_v54  ;;  %2305 = vmatprep.mubr.bf16.mxu1 %v3497_v44  ;;  %v3229_v54 = vld [vmem:[#allocation8 + $0x520] ss:$28 sps:$4 sm:$0xff]  }
 0x264   :  { %2771 = vmatpush3.bf16.msra.mxu0 %v3154_v56  ;;  %2387 = vmatprep.mubr.bf16.mxu0 %v3497_v44  ;;  %v3173_v44 = vld [vmem:[#allocation8 + $0x2b8] ss:$28 sps:$4 sm:$0xff]  }
 0x265   :  { %2275 = vmatprep.subr.bf16.mxu1 %v3157_v57  ;;  %2772 = vmatprep.subr.bf16.mxu0 %v3158_v58  ;;  %v3232_v56 = vld [vmem:[#allocation8 + $0x394] ss:$28 sps:$4 sm:$0xff]   ;;  %v3235_v58 = vld [vmem:[#allocation8 + $0x3cc] ss:$28 sps:$4 sm:$0xff]  }
 0x266   :  { %v3230_v57 = vld [vmem:[#allocation8 + $0x390] ss:$28 sps:$4 sm:$0xff]  }
 0x267   :  { %2276 = vmatpush1.bf16.msra.mxu1 %v3155_v59  ;;  %v3233_v59 = vld [vmem:[#allocation8 + $0x3c8] ss:$28 sps:$4 sm:$0xff]  }
 0x268   :  { %2773 = vmatpush3.bf16.msra.mxu0 %v3159_v32  ;;  %2277 = vmatprep.subr.bf16.mxu1 %v3162_v60  ;;  %v3238_v32 = vld [vmem:[#allocation8 + $0x404] ss:$28 sps:$4 sm:$0xff]  }
 0x269   :  { %2774 = vmatprep.subr.bf16.mxu0 %v3163_v61  ;;  %v3236_v60 = vld [vmem:[#allocation8 + $0x400] ss:$28 sps:$4 sm:$0xff]  }
 0x26a   :  { %v3241_v61 = vld [vmem:[#allocation8 + $0x43c] ss:$28 sps:$4 sm:$0xff]  }
 0x26b   :  { %2278 = vmatpush1.bf16.msra.mxu1 %v3160_v62  ;;  %v3239_v62 = vld [vmem:[#allocation8 + $0x438] ss:$28 sps:$4 sm:$0xff]  }
 0x26c   :  { %2775 = vmatpush3.bf16.msra.mxu0 %v3164_v63  ;;  %2279 = vmatprep.subr.bf16.mxu1 %v3167_v0  ;;  %v3244_v63 = vld [vmem:[#allocation8 + $0x474] ss:$28 sps:$4 sm:$0xff]  }
 0x26d   :  { %2776 = vmatprep.subr.bf16.mxu0 %v3168_v1  ;;  %v3242_v0 = vld [vmem:[#allocation8 + $0x470] ss:$28 sps:$4 sm:$0xff]   ;;  %v3245_v1 = vld [vmem:[#allocation8 + $0x4a8] ss:$28 sps:$4 sm:$0xff]  }
 0x26f   :  { %2280 = vmatpush1.bf16.msra.mxu1 %v3165_v2  ;;  %v3250_v2 = vld [vmem:[#allocation8 + $0x4e4] ss:$28 sps:$4 sm:$0xff]  }
 0x270   :  { %2777 = vmatpush3.bf16.msra.mxu0 %v3169_v3  ;;  %2281 = vmatprep.subr.bf16.mxu1 %v3172_v4  ;;  %v3253_v3 = vld [vmem:[#allocation8 + $0x51c] ss:$28 sps:$4 sm:$0xff]  }
 0x271   :  { %2778 = vmatprep.subr.bf16.mxu0 %v3173_v44  ;;  %v3251_v4 = vld [vmem:[#allocation8 + $0x518] ss:$28 sps:$4 sm:$0xff]  }
 0x272   :  { %v3256_v44 = vld [vmem:[#allocation8 + $0x554] ss:$28 sps:$4 sm:$0xff]  }
 0x273   :  { %2282 = vmatpush1.bf16.msra.mxu1 %v3170_v5  ;;  %v3254_v5 = vld [vmem:[#allocation8 + $0x550] ss:$28 sps:$4 sm:$0xff]  }
 0x274   :  { %2779 = vmatpush3.bf16.msra.mxu0 %v3174_v6  ;;  %2283 = vmatprep.subr.bf16.mxu1 %v3177_v7  ;;  %v3259_v6 = vld [vmem:[#allocation8 + $0x58c] ss:$28 sps:$4 sm:$0xff]  }
 0x275   :  { %2780 = vmatprep.subr.bf16.mxu0 %v3178_v8  ;;  %v3257_v7 = vld [vmem:[#allocation8 + $0x588] ss:$28 sps:$4 sm:$0xff]  }
 0x276   :  { %v3262_v8 = vld [vmem:[#allocation8 + $0x5c4] ss:$28 sps:$4 sm:$0xff]  }
 0x277   :  { %2284 = vmatpush1.bf16.msra.mxu1 %v3175_v9  ;;  %v3260_v9 = vld [vmem:[#allocation8 + $0x5c0] ss:$28 sps:$4 sm:$0xff]  }
 0x278   :  { %2781 = vmatpush3.bf16.msra.mxu0 %v3179_v10  ;;  %2285 = vmatprep.subr.bf16.mxu1 %v3182_v11  ;;  %v3265_v10 = vld [vmem:[#allocation8 + $0x5fc] ss:$28 sps:$4 sm:$0xff]  }
 0x279   :  { %2782 = vmatprep.subr.bf16.mxu0 %v3183_v12  ;;  %v3263_v11 = vld [vmem:[#allocation8 + $0x5f8] ss:$28 sps:$4 sm:$0xff]  }
 0x27a   :  { %v3268_v12 = vld [vmem:[#allocation8 + $0x634] ss:$28 sps:$4 sm:$0xff]  }
 0x27b   :  { %2286 = vmatpush1.bf16.msra.mxu1 %v3180_v13  ;;  %v3266_v13 = vld [vmem:[#allocation8 + $0x630] ss:$28 sps:$4 sm:$0xff]  }
 0x27c   :  { %2783 = vmatpush3.bf16.msra.mxu0 %v3184_v14  ;;  %2287 = vmatprep.subr.bf16.mxu1 %v3187_v15  ;;  %v3271_v14 = vld [vmem:[#allocation8 + $0x66c] ss:$28 sps:$4 sm:$0xff]  }
 0x27d   :  { %2784 = vmatprep.subr.bf16.mxu0 %v3188_v16  ;;  %v3269_v15 = vld [vmem:[#allocation8 + $0x668] ss:$28 sps:$4 sm:$0xff]  }
 0x27e   :  { %v3274_v16 = vld [vmem:[#allocation8 + $0x6a4] ss:$28 sps:$4 sm:$0xff]  }
 0x27f   :  { %2288 = vmatpush1.bf16.msra.mxu1 %v3185_v17  ;;  %v3272_v17 = vld [vmem:[#allocation8 + $0x6a0] ss:$28 sps:$4 sm:$0xff]  }
 0x280   :  { %2785 = vmatpush3.bf16.msra.mxu0 %v3189_v18  ;;  %2289 = vmatprep.subr.bf16.mxu1 %v3192_v19  ;;  %v3277_v18 = vld [vmem:[#allocation8 + $0x6dc] ss:$28 sps:$4 sm:$0xff]  }
 0x281   :  { %2792 = vmatprep.subr.bf16.mxu0 %v3193_v20  ;;  %v3275_v19 = vld [vmem:[#allocation8 + $0x6d8] ss:$28 sps:$4 sm:$0xff]  }
 0x283   :  { %2388 = vmatmul.mubr.bf16.vlgmr.msra.gmra.mrb[12].mxu0 %v3499_v48  ;;  %2290 = vmatpush1.bf16.msra.mxu1 %v3190_v21 }
 0x284   :  { %2793 = vmatpush3.bf16.msra.mxu0 %v3194_v22  ;;  %2427 = vmatprep.mubr.bf16.mxu0 %v3503_v51 }
 0x285   :  { %2291 = vmatprep.subr.bf16.mxu1 %v3197_v23  ;;  %2794 = vmatprep.subr.bf16.mxu0 %v3198_v24 }
 0x287   :  { %2292 = vmatpush1.bf16.msra.mxu1 %v3195_v25 }
 0x288   :  { %2795 = vmatpush3.bf16.msra.mxu0 %v3199_v26  ;;  %2293 = vmatprep.subr.bf16.mxu1 %v3202_v27 }
 0x289   :  { %2796 = vmatprep.subr.bf16.mxu0 %v3203_v28 }
 0x28b   :  { %2294 = vmatpush1.bf16.msra.mxu1 %v3200_v29 }
 0x28c   :  { %2797 = vmatpush3.bf16.msra.mxu0 %v3204_v30  ;;  %2295 = vmatprep.subr.bf16.mxu1 %v3207_v31 }
 0x28d   :  { %2798 = vmatprep.subr.bf16.mxu0 %v3208_v33 }
 0x28f   :  { %2296 = vmatpush1.bf16.msra.mxu1 %v3205_v34 }
 0x290   :  { %2799 = vmatpush3.bf16.msra.mxu0 %v3209_v35  ;;  %2297 = vmatprep.subr.bf16.mxu1 %v3212_v36 }
 0x291   :  { %2800 = vmatprep.subr.bf16.mxu0 %v3213_v37 }
 0x293   :  { %2298 = vmatpush1.bf16.msra.mxu1 %v3210_v38 }
 0x294   :  { %2801 = vmatpush3.bf16.msra.mxu0 %v3214_v39  ;;  %2299 = vmatprep.subr.bf16.mxu1 %v3217_v40 }
 0x295   :  { %2802 = vmatprep.subr.bf16.mxu0 %v3218_v41 }
 0x297   :  { %2300 = vmatpush1.bf16.msra.mxu1 %v3215_v42 }
 0x298   :  { %2803 = vmatpush3.bf16.msra.mxu0 %v3219_v43  ;;  %2301 = vmatprep.subr.bf16.mxu1 %v3222_v45 }
 0x299   :  { %2804 = vmatprep.subr.bf16.mxu0 %v3223_v46 }
 0x29b   :  { %2302 = vmatpush1.bf16.msra.mxu1 %v3220_v47 }
 0x29c   :  { %2805 = vmatpush3.bf16.msra.mxu0 %v3224_v49  ;;  %2303 = vmatprep.subr.bf16.mxu1 %v3227_v50 }
 0x29d   :  { %2806 = vmatprep.subr.bf16.mxu0 %v3228_v52 }
 0x29f   :  { %2304 = vmatpush1.bf16.msra.mxu1 %v3225_v53 }
 0x2a0   :  { %2807 = vmatpush3.bf16.msra.mxu0 %v3229_v54  ;;  %2314 = vmatprep.subr.bf16.mxu1 %v3232_v56 }
 0x2a2   :  { %2306 = vmatmul.mubr.bf16.vlgmr.msra.gmra.mrb[8].mxu1 %v3499_v48  ;;  %v3247_v48 = vld [vmem:[#allocation8 + $0x4ac] ss:$28 sps:$4 sm:$0xff]  }
 0x2a3   :  { %2428 = vmatmul.mubr.bf16.vlgmr.msra.gmra.mrb[16].mxu0 %v3512_v55  ;;  %2315 = vmatpush1.bf16.msra.mxu1 %v3230_v57 }
 0x2a4   :  { %2346 = vmatprep.mubr.bf16.mxu1 %v3503_v51  ;;  %2316 = vmatprep.subr.bf16.mxu1 %v3235_v58  ;;  %v3248_v51 = vld [vmem:[#allocation8 + $0x4e0] ss:$28 sps:$4 sm:$0xff]  }
 0x2a7   :  { %2317 = vmatpush1.bf16.msra.mxu1 %v3233_v59 }
 0x2a8   :  { %2318 = vmatprep.subr.bf16.mxu1 %v3238_v32 }
 0x2ab   :  { %2319 = vmatpush1.bf16.msra.mxu1 %v3236_v60 }
 0x2ac   :  { %2320 = vmatprep.subr.bf16.mxu1 %v3241_v61 }
 0x2af   :  { %2321 = vmatpush1.bf16.msra.mxu1 %v3239_v62 }
 0x2b0   :  { %2322 = vmatprep.subr.bf16.mxu1 %v3244_v63 }
 0x2b3   :  { %2323 = vmatpush1.bf16.msra.mxu1 %v3242_v0 }
 0x2b4   :  { %2324 = vmatprep.subr.bf16.mxu1 %v3247_v48 }
 0x2b7   :  { %2325 = vmatpush1.bf16.msra.mxu1 %v3245_v1 }
 0x2b8   :  { %2326 = vmatprep.subr.bf16.mxu1 %v3250_v2 }
 0x2bb   :  { %2327 = vmatpush1.bf16.msra.mxu1 %v3248_v51 }
 0x2bc   :  { %2328 = vmatprep.subr.bf16.mxu1 %v3253_v3 }
 0x2bf   :  { %2329 = vmatpush1.bf16.msra.mxu1 %v3251_v4 }
 0x2c0   :  { %2330 = vmatprep.subr.bf16.mxu1 %v3256_v44 }
 0x2c3   :  { %2331 = vmatpush1.bf16.msra.mxu1 %v3254_v5 }
 0x2c4   :  { %2332 = vmatprep.subr.bf16.mxu1 %v3259_v6 }
 0x2c7   :  { %2333 = vmatpush1.bf16.msra.mxu1 %v3257_v7 }
 0x2c8   :  { %2334 = vmatprep.subr.bf16.mxu1 %v3262_v8 }
 0x2cb   :  { %2335 = vmatpush1.bf16.msra.mxu1 %v3260_v9 }
 0x2cc   :  { %2336 = vmatprep.subr.bf16.mxu1 %v3265_v10 }
 0x2cf   :  { %2337 = vmatpush1.bf16.msra.mxu1 %v3263_v11 }
 0x2d0   :  { %2338 = vmatprep.subr.bf16.mxu1 %v3268_v12 }
 0x2d3   :  { %2339 = vmatpush1.bf16.msra.mxu1 %v3266_v13 }
 0x2d4   :  { %2340 = vmatprep.subr.bf16.mxu1 %v3271_v14 }
 0x2d7   :  { %2341 = vmatpush1.bf16.msra.mxu1 %v3269_v15 }
 0x2d8   :  { %2342 = vmatprep.subr.bf16.mxu1 %v3274_v16 }
 0x2db   :  { %2343 = vmatpush1.bf16.msra.mxu1 %v3272_v17 }
 0x2dc   :  { %2344 = vmatprep.subr.bf16.mxu1 %v3277_v18 }
 0x2df   :  { %2345 = vmatpush1.bf16.msra.mxu1 %v3275_v19 }
 0x2e2   :  { %2347 = vmatmul.mubr.bf16.vlgmr.msra.gmra.mrb[8].mxu1 %v3512_v55 }
 0x335   :  { %v2184_v20 = vpop.f32.mrb[4].mxu1  ;;  %v2266_v21 = vpop.f32.mrb[8].mxu0 }
 0x336   :  { %3278 = vtanh.f32 %v2184_v20  ;;  %v2186_v22 = vpop.f32.mrb[5].mxu1  ;;  %v2268_v23 = vpop.f32.mrb[9].mxu0 }
 0x337   :  { %3280 = vtanh.f32 %v2266_v21  ;;  %v2188_v24 = vpop.f32.mrb[6].mxu1  ;;  %v2270_v25 = vpop.f32.mrb[10].mxu0 }
 0x338   :  { %3282 = vtanh.f32 %v2186_v22  ;;  %v2189_v26 = vpop.f32.mrb[7].mxu1  ;;  %v2271_v27 = vpop.f32.mrb[11].mxu0 }
 0x339   :  { %3284 = vtanh.f32 %v2268_v23 }
 0x340   :  { %v3279_v28 = vpop.eup %3278 }
 0x341   :  { %v3281_v29 = vpop.eup %3280  ;;  %2442 = vst [vmem:[#allocation10] sm:$0xff] %v3279_v28 }
 0x342   :  { %v3283_v30 = vpop.eup %3282  ;;  %2444 = vst [vmem:[#allocation10 + $0x10] sm:$0xff] %v3281_v29 }
 0x343   :  { %v3285_v31 = vpop.eup %3284  ;;  %2443 = vst [vmem:[#allocation10 + $0x8] sm:$0xff] %v3283_v30 }
 0x344   :  { %2445 = vst [vmem:[#allocation10 + $0x18] sm:$0xff] %v3285_v31 }
 0x356   :  { %v2786_v55 = vpop.f32.mrb[12].mxu0 }
 0x357   :  { %v2787_v33 = vpop.f32.mrb[13].mxu0 }
 0x358   :  { %v2788_v34 = vadd.f32 %v2787_v33, %v2786_v55  ;;  %v2789_v35 = vpop.f32.mrb[14].mxu0 }
 0x359   :  { %v2790_v36 = vpop.f32.mrb[15].mxu0 }
 0x376   :  { %v2808_v37 = vpop.f32.mrb[16].mxu0 }
 0x377   :  { %v2809_v38 = vpop.f32.mrb[17].mxu0 }
 0x378   :  { %v2810_v39 = vadd.f32 %v2809_v38, %v2808_v37  ;;  %v2811_v40 = vpop.f32.mrb[18].mxu0 }
 0x379   :  { %v2812_v41 = vpop.f32.mrb[19].mxu0 }
 0x37a   :  { %v2430_v42 = vadd.f32 %v2810_v39, %v2788_v34 }
 0x37c   :  { %3286 = vtanh.f32 %v2430_v42 }
 0x386   :  { %v3287_v43 = vpop.eup %3286 }
 0x387   :  { %2448 = vst [vmem:[#allocation10 + $0x30] sm:$0xff] %v3287_v43 }
 0x3b5   :  { %v2348_v45 = vpop.f32.mrb[8].mxu1 }
 0x3b6   :  { %3288 = vtanh.f32 %v2348_v45  ;;  %v2350_v46 = vpop.f32.mrb[9].mxu1 }
 0x3b7   :  { %3290 = vtanh.f32 %v2350_v46  ;;  %v2352_v47 = vpop.f32.mrb[10].mxu1 }
 0x3b8   :  { %v2353_v49 = vpop.f32.mrb[11].mxu1 }
 0x3c0   :  { %v3289_v50 = vpop.eup %3288 }
 0x3c1   :  { %v3291_v52 = vpop.eup %3290  ;;  %2446 = vst [vmem:[#allocation10 + $0x20] sm:$0xff] %v3289_v50 }
 0x3c2   :  { %2447 = vst [vmem:[#allocation10 + $0x28] sm:$0xff] %v3291_v52 }
 0x3c3   :  { %3391 = shalt.err (!%p3388_p8)
}
 0x3c4   :  { %s3392_s17 = scalar_lea.hbm %s3540_s4, 896 }
 0x3c5   :  { %p3393_p9 = scmp.ne.s32.totalorder %s3540_s4, %s3392_s17  ;;  %p3396_p10 = scmp.lt.u32.totalorder %s3392_s17, %s3540_s4 }
 0x3c7   :  { %p3398_p11 = pnand %p3396_p10, %p3393_p9 }
 0x3c9   :  { %3401 = shalt.err (!%p3398_p11)
}
 0x3ca   :  { %2458 = dma.vmem_to_hbm [thread:$0]  %s2456_s1, 896, %s3540_s4, [#allocation4]  }
 0x3cb   :  { %3408 = dma.done.wait [#allocation4], 896  }
 0x3cc   :  { %3409 = vsyncadd [#allocation4], 4294966400 }
 0x3cd   :  { %2462 = vsyncpa [#allocation3], 1 }
 0x3ce   :  { %2463 = vsyncpa [#allocation6], 1 }
 0x3cf   :  { %2464 = vsyncpa [#allocation9], 1 }
 0x3d0   :  { %2465 = vsyncpa [#allocation4], 1 }

</bundles_post_ra>
